<compile_context>
chip_gen: v7x
topology: tpu7x:2x2x1
jax: 0.10.0
libtpu: 0.0.40
codegen_flags: <defaults>
</compile_context>

<pallas_src>
import jax
import jax.numpy as jnp
from jax import lax
from jax.experimental import pallas as pl
from jax.experimental.pallas import tpu as pltpu


# ---------------------------------------------------------------------------
# Fused Pallas kernel: all LSTM layers + final Linear
# ---------------------------------------------------------------------------
def make_fused_kernel(num_layers, hidden):
    """Builds the fused kernel.

    Ref layout (positional):
      x_ref                                : (Tt, B, D_in)   time-block of input
      for each layer l: wih_l (d_in, 4H), whh_l (H, 4H), bias_l (1, 4H)
      fc_w (H, P), fc_b (1, P)
      out_ref                              : (B, P)
      scratch: seq_scr (Tt, B, H), gates_scr (Tt, B, 4H),
               h_scr (L, B, H), c_scr (L, B, H)
    Gate order along the 4H axis is [i, f, o, g].
    """
    H = hidden

    def kernel(*refs):
        n_w = 3 * num_layers + 2
        x_ref = refs[0]
        w_refs = refs[1:1 + n_w]
        out_ref = refs[1 + n_w]
        seq_scr, gates_scr, h_scr, c_scr = refs[2 + n_w:]

        Tt, B, _ = x_ref.shape
        step_i = pl.program_id(0)

        # Initialize recurrent state at the first time block.
        @pl.when(step_i == 0)
        def _init():
            h_scr[...] = jnp.zeros_like(h_scr)
            c_scr[...] = jnp.zeros_like(c_scr)

        layer_in = x_ref[...]                                  # (Tt, B, d_in)
        for l in range(num_layers):
            # Hoisted, loop-invariant loads (once per layer per time block).
            wih = w_refs[3 * l][...]                           # (d_in, 4H)
            whh = w_refs[3 * l + 1][...]                       # (H, 4H)
            bias = w_refs[3 * l + 2][...]                      # (1, 4H)
            d_in = wih.shape[0]

            # Batched (non-recurrent) input projection over the whole time block:
            # one MXU matmul with Tt*B rows instead of Tt tiny matmuls.
            gx = jnp.dot(layer_in.reshape(Tt * B, d_in), wih,
                         preferred_element_type=jnp.float32) + bias
            gates_scr[...] = gx.reshape(Tt, B, 4 * H)

            def step(t, carry, whh=whh):
                h, c = carry
                gates = gates_scr[t] + jnp.dot(
                    h, whh, preferred_element_type=jnp.float32)   # (B, 4H)
                # Gate order [i, f, o | g]: one sigmoid region, one tanh region.
                sig = jax.nn.sigmoid(gates[:, :3 * H])
                g = jnp.tanh(gates[:, 3 * H:])
                i_g = sig[:, :H]
                f_g = sig[:, H:2 * H]
                o_g = sig[:, 2 * H:3 * H]
                c_new = f_g * c + i_g * g
                h_new = o_g * jnp.tanh(c_new)
                seq_scr[t] = h_new
                return (h_new, c_new)

            h_f, c_f = lax.fori_loop(0, Tt, step, (h_scr[l], c_scr[l]),
                                     unroll=True)
            h_scr[l] = h_f
            c_scr[l] = c_f
            layer_in = seq_scr[...]                            # input to next layer

        # Final FC only on the last time block (out[:, -1, :] @ W_fc^T + b_fc).
        @pl.when(step_i == pl.num_programs(0) - 1)
        def _final():
            fc_w = w_refs[3 * num_layers][...]                 # (H, P)
            fc_b = w_refs[3 * num_layers + 1][...]             # (1, P)
            out_ref[...] = (
                jnp.dot(h_scr[num_layers - 1], fc_w,
                        preferred_element_type=jnp.float32) + fc_b
            ).astype(out_ref.dtype)

    return kernel


# ---------------------------------------------------------------------------
# Wrapper
# ---------------------------------------------------------------------------
def lstm_predictor_pallas(kparams, x, *, block_t=4):
    """x: (B, T, D) batch-first (PyTorch convention) -> (B, pred_len)."""
    B, T, D = x.shape
    layers = kparams["layers"]
    L = len(layers)
    H = layers[0]["w_hh_t"].shape[0]
    P = kparams["fc_w_t"].shape[1]
    if T % block_t != 0:
        block_t = T

    x_tbd = jnp.transpose(x, (1, 0, 2)).astype(jnp.float32)    # (T, B, D)

    weight_args = []
    weight_specs = []
    for lp in layers:
        for name in ("w_ih_t", "w_hh_t", "bias"):
            w = lp[name]
            weight_args.append(w)
            weight_specs.append(
                pl.BlockSpec(w.shape, lambda i, nd=w.ndim: (0,) * nd))
    for name in ("fc_w_t", "fc_b"):
        w = kparams[name]
        weight_args.append(w)
        weight_specs.append(
            pl.BlockSpec(w.shape, lambda i, nd=w.ndim: (0,) * nd))

    kernel = make_fused_kernel(L, H)
    grid = (T // block_t,)

    return pl.pallas_call(
        kernel,
        out_shape=jax.ShapeDtypeStruct((B, P), jnp.float32),
        grid_spec=pltpu.PrefetchScalarGridSpec(
            num_scalar_prefetch=0,
            grid=grid,
            in_specs=[pl.BlockSpec((block_t, B, D), lambda i: (i, 0, 0))]
            + weight_specs,
            out_specs=pl.BlockSpec((B, P), lambda i: (0, 0)),
            scratch_shapes=[
                pltpu.VMEM((block_t, B, H), jnp.float32),        # hidden seq (block)
                pltpu.VMEM((block_t, B, 4 * H), jnp.float32),    # hoisted x-gates
                pltpu.VMEM((L, B, H), jnp.float32),              # h state per layer
                pltpu.VMEM((L, B, H), jnp.float32),              # c state per layer
            ],
        ),
        compiler_params=pltpu.CompilerParams(
            dimension_semantics=("arbitrary",),
            vmem_limit_bytes=32 * 1024 * 1024,
        ),
    )(x_tbd, *weight_args)


# ---------------------------------------------------------------------------
# Parameter init (PyTorch layout) and conversion to kernel layout
# ---------------------------------------------------------------------------
def init_params(key, input_dim, hidden_dim, num_layers, pred_len):
    """PyTorch-layout params: w_ih (4H,d_in), w_hh (4H,H), gate order [i,f,g,o]."""
    params = {"layers": []}
    k = 1.0 / float(jnp.sqrt(jnp.float32(hidden_dim)))
    keys = jax.random.split(key, num_layers * 4 + 2)
    idx = 0
    for l in range(num_layers):
        d_in = input_dim if l == 0 else hidden_dim
        w_ih = jax.random.uniform(keys[idx], (4 * hidden_dim, d_in), jnp.float32, -k, k); idx += 1
        w_hh = jax.random.uniform(keys[idx], (4 * hidden_dim, hidden_dim), jnp.float32, -k, k); idx += 1
        b_ih = jax.random.uniform(keys[idx], (4 * hidden_dim,), jnp.float32, -k, k); idx += 1
        b_hh = jax.random.uniform(keys[idx], (4 * hidden_dim,), jnp.float32, -k, k); idx += 1
        params["layers"].append({"w_ih": w_ih, "w_hh": w_hh, "b_ih": b_ih, "b_hh": b_hh})
    params["fc_w"] = jax.random.uniform(keys[idx], (pred_len, hidden_dim), jnp.float32, -k, k); idx += 1
    params["fc_b"] = jax.random.uniform(keys[idx], (pred_len,), jnp.float32, -k, k)
    return params


def prepare_kernel_params(params):
    """Transpose weights, combine biases, reorder gates [i,f,g,o] -> [i,f,o,g]."""
    def reorder(w4h):
        H = w4h.shape[0] // 4
        return jnp.concatenate([w4h[:2 * H], w4h[3 * H:], w4h[2 * H:3 * H]], axis=0)

    kp = {"layers": []}
    for lp in params["layers"]:
        w_ih = reorder(lp["w_ih"])                  # (4H, d_in)
        w_hh = reorder(lp["w_hh"])                  # (4H, H)
        bias = reorder(lp["b_ih"] + lp["b_hh"])     # (4H,)
        kp["layers"].append({
            "w_ih_t": jnp.transpose(w_ih),          # (d_in, 4H)
            "w_hh_t": jnp.transpose(w_hh),          # (H, 4H)
            "bias": bias[None, :],                  # (1, 4H)
        })
    kp["fc_w_t"] = jnp.transpose(params["fc_w"])    # (H, P)
    kp["fc_b"] = params["fc_b"][None, :]            # (1, P)
    return kp


# ---------------------------------------------------------------------------
# Pure-JAX reference (PyTorch semantics, untouched gate order)
# ---------------------------------------------------------------------------
def reference_forward(params, x):
    h_seq = jnp.transpose(x, (1, 0, 2)).astype(jnp.float32)
    for lp in params["layers"]:
        H = lp["w_hh"].shape[1]
        B = h_seq.shape[1]
        w_ih_t = lp["w_ih"].T
        w_hh_t = lp["w_hh"].T
        b = lp["b_ih"] + lp["b_hh"]

        def step(carry, x_t, w_ih_t=w_ih_t, w_hh_t=w_hh_t, b=b, H=H):
            hh, cc = carry
            gates = x_t @ w_ih_t + hh @ w_hh_t + b
            i = jax.nn.sigmoid(gates[:, :H])
            f = jax.nn.sigmoid(gates[:, H:2 * H])
            g = jnp.tanh(gates[:, 2 * H:3 * H])
            o = jax.nn.sigmoid(gates[:, 3 * H:])
            cc = f * cc + i * g
            hh = o * jnp.tanh(cc)
            return (hh, cc), hh

        init = (jnp.zeros((B, H), jnp.float32), jnp.zeros((B, H), jnp.float32))
        _, h_seq = lax.scan(step, init, h_seq)
    return h_seq[-1] @ params["fc_w"].T + params["fc_b"]


# ---------------------------------------------------------------------------
if __name__ == "__main__":
    B, T, D, H, L, P = 2, 8, 4, 32, 2, 3   # batch, seq, input_dim, hidden, layers, pred_len

    key = jax.random.PRNGKey(0)
    kp_key, kx = jax.random.split(key)
    params = init_params(kp_key, D, H, L, P)
    kparams = prepare_kernel_params(params)
    x = jax.random.normal(kx, (B, T, D), jnp.float32)

    fwd = jax.jit(lambda kp, xx: lstm_predictor_pallas(kp, xx, block_t=4))
    out = jax.block_until_ready(fwd(kparams, x))

    ref = reference_forward(params, x)
    assert out.shape == (B, P), out.shape
    assert jnp.allclose(out, ref, atol=2e-4, rtol=2e-4), (out, ref)

    print("KERNEL_OK")
</pallas_src>

<mosaic_0001>
module attributes {stable_mosaic.version = 11 : i64} {
  func.func @kernel(%arg0: i32, %arg1: memref<4x2x4xf32, #tpu.memory_space<vmem>>, %arg2: memref<4x128xf32, #tpu.memory_space<vmem>>, %arg3: memref<32x128xf32, #tpu.memory_space<vmem>>, %arg4: memref<1x128xf32, #tpu.memory_space<vmem>>, %arg5: memref<32x128xf32, #tpu.memory_space<vmem>>, %arg6: memref<32x128xf32, #tpu.memory_space<vmem>>, %arg7: memref<1x128xf32, #tpu.memory_space<vmem>>, %arg8: memref<32x3xf32, #tpu.memory_space<vmem>>, %arg9: memref<1x3xf32, #tpu.memory_space<vmem>>, %arg10: memref<2x3xf32, #tpu.memory_space<vmem>>, %arg11: memref<4x2x32xf32, #tpu.memory_space<vmem>>, %arg12: memref<4x2x128xf32, #tpu.memory_space<vmem>>, %arg13: memref<2x2x32xf32, #tpu.memory_space<vmem>>, %arg14: memref<2x2x32xf32, #tpu.memory_space<vmem>>) attributes {dimension_semantics = [#tpu.dimension_semantics<arbitrary>], iteration_bounds = array<i64: 2>, scalar_prefetch = 0 : i64, scratch_operands = 4 : i64, tpu.core_type = #tpu.core_type<tc>, window_params = [{transform_indices = @transform_0, window_bounds = array<i64: 4, 2, 4>}, {pipeline_mode = #tpu.pipeline_mode<synchronous>, transform_indices = @transform_1, window_bounds = array<i64: 4, 128>}, {pipeline_mode = #tpu.pipeline_mode<synchronous>, transform_indices = @transform_2, window_bounds = array<i64: 32, 128>}, {pipeline_mode = #tpu.pipeline_mode<synchronous>, transform_indices = @transform_3, window_bounds = array<i64: 1, 128>}, {pipeline_mode = #tpu.pipeline_mode<synchronous>, transform_indices = @transform_4, window_bounds = array<i64: 32, 128>}, {pipeline_mode = #tpu.pipeline_mode<synchronous>, transform_indices = @transform_5, window_bounds = array<i64: 32, 128>}, {pipeline_mode = #tpu.pipeline_mode<synchronous>, transform_indices = @transform_6, window_bounds = array<i64: 1, 128>}, {pipeline_mode = #tpu.pipeline_mode<synchronous>, transform_indices = @transform_7, window_bounds = array<i64: 32, 3>}, {pipeline_mode = #tpu.pipeline_mode<synchronous>, transform_indices = @transform_8, window_bounds = array<i64: 1, 3>}, {pipeline_mode = #tpu.pipeline_mode<synchronous>, transform_indices = @transform_9, window_bounds = array<i64: 2, 3>}]} {
    %c0_i32 = arith.constant 0 : i32
    %0 = arith.cmpi eq, %arg0, %c0_i32 : i32
    %1 = arith.extui %0 : i1 to i32
    %c0_i32_0 = arith.constant 0 : i32
    %2 = arith.cmpi ne, %1, %c0_i32_0 : i32
    scf.if %2 {
      %cst_104 = arith.constant 0.000000e+00 : f32
      %246 = vector.broadcast %cst_104 : f32 to vector<2x2x32xf32>
      %c0_105 = arith.constant 0 : index
      %c0_106 = arith.constant 0 : index
      %c0_107 = arith.constant 0 : index
      %247 = vector.load %arg13[%c0_105, %c0_106, %c0_107] : memref<2x2x32xf32, #tpu.memory_space<vmem>>, vector<2x2x32xf32>
      tpu.vector_store %arg13[%c0_105, %c0_106, %c0_107], %246 {strides = array<i32>} : memref<2x2x32xf32, #tpu.memory_space<vmem>>, vector<2x2x32xf32>,
      %cst_108 = arith.constant 0.000000e+00 : f32
      %248 = vector.broadcast %cst_108 : f32 to vector<2x2x32xf32>
      %c0_109 = arith.constant 0 : index
      %c0_110 = arith.constant 0 : index
      %c0_111 = arith.constant 0 : index
      %249 = vector.load %arg14[%c0_109, %c0_110, %c0_111] : memref<2x2x32xf32, #tpu.memory_space<vmem>>, vector<2x2x32xf32>
      tpu.vector_store %arg14[%c0_109, %c0_110, %c0_111], %248 {strides = array<i32>} : memref<2x2x32xf32, #tpu.memory_space<vmem>>, vector<2x2x32xf32>,
    } else {
    }
    %c0 = arith.constant 0 : index
    %c0_1 = arith.constant 0 : index
    %c0_2 = arith.constant 0 : index
    %3 = vector.load %arg1[%c0, %c0_1, %c0_2] : memref<4x2x4xf32, #tpu.memory_space<vmem>>, vector<4x2x4xf32>
    %c0_3 = arith.constant 0 : index
    %c0_4 = arith.constant 0 : index
    %4 = vector.load %arg2[%c0_3, %c0_4] : memref<4x128xf32, #tpu.memory_space<vmem>>, vector<4x128xf32>
    %c0_5 = arith.constant 0 : index
    %c0_6 = arith.constant 0 : index
    %5 = vector.load %arg3[%c0_5, %c0_6] : memref<32x128xf32, #tpu.memory_space<vmem>>, vector<32x128xf32>
    %c0_7 = arith.constant 0 : index
    %c0_8 = arith.constant 0 : index
    %6 = vector.load %arg4[%c0_7, %c0_8] : memref<1x128xf32, #tpu.memory_space<vmem>>, vector<1x128xf32>
    %7 = vector.shape_cast %3 : vector<4x2x4xf32> to vector<8x4xf32>
    %cst = arith.constant dense<0.000000e+00> : vector<8x128xf32>
    %8 = tpu.matmul %7, %4, %cst {dimension_numbers = #tpu.dot_dimension_numbers<[1], [0], [0], [1], [0, 0, 1, 1], [], []>} : vector<8x4xf32>, vector<4x128xf32>, vector<8x128xf32> -> vector<8x128xf32>
    %9 = vector.broadcast %6 : vector<1x128xf32> to vector<8x128xf32>
    %10 = arith.addf %8, %9 : vector<8x128xf32>
    %11 = vector.shape_cast %10 : vector<8x128xf32> to vector<4x2x128xf32>
    %c0_9 = arith.constant 0 : index
    %c0_10 = arith.constant 0 : index
    %c0_11 = arith.constant 0 : index
    %12 = vector.load %arg12[%c0_9, %c0_10, %c0_11] : memref<4x2x128xf32, #tpu.memory_space<vmem>>, vector<4x2x128xf32>
    tpu.vector_store %arg12[%c0_9, %c0_10, %c0_11], %11 {strides = array<i32>} : memref<4x2x128xf32, #tpu.memory_space<vmem>>, vector<4x2x128xf32>,
    %c0_12 = arith.constant 0 : index
    %c0_13 = arith.constant 0 : index
    %c0_14 = arith.constant 0 : index
    %13 = vector.load %arg13[%c0_12, %c0_13, %c0_14] : memref<2x2x32xf32, #tpu.memory_space<vmem>>, vector<1x2x32xf32>
    %14 = vector.shape_cast %13 : vector<1x2x32xf32> to vector<2x32xf32>
    %c0_15 = arith.constant 0 : index
    %c0_16 = arith.constant 0 : index
    %c0_17 = arith.constant 0 : index
    %15 = vector.load %arg14[%c0_15, %c0_16, %c0_17] : memref<2x2x32xf32, #tpu.memory_space<vmem>>, vector<1x2x32xf32>
    %16 = vector.shape_cast %15 : vector<1x2x32xf32> to vector<2x32xf32>
    %c0_i32_18 = arith.constant 0 : i32
    %17 = arith.index_cast %c0_i32_18 : i32 to index
    %c0_19 = arith.constant 0 : index
    %c0_20 = arith.constant 0 : index
    %18 = vector.load %arg12[%17, %c0_19, %c0_20] : memref<4x2x128xf32, #tpu.memory_space<vmem>>, vector<1x2x128xf32>
    %19 = vector.shape_cast %18 : vector<1x2x128xf32> to vector<2x128xf32>
    %cst_21 = arith.constant dense<0.000000e+00> : vector<2x128xf32>
    %20 = tpu.matmul %14, %5, %cst_21 {dimension_numbers = #tpu.dot_dimension_numbers<[1], [0], [0], [1], [0, 0, 1, 1], [], []>} : vector<2x32xf32>, vector<32x128xf32>, vector<2x128xf32> -> vector<2x128xf32>
    %21 = arith.addf %19, %20 : vector<2x128xf32>
    %22 = vector.extract_strided_slice %21 {offsets = [0, 0], sizes = [2, 96], strides = [1, 1]} : vector<2x128xf32> to vector<2x96xf32>
    %23 = arith.negf %22 : vector<2x96xf32>
    %24 = math.exp %23 : vector<2x96xf32>
    %cst_22 = arith.constant 1.000000e+00 : f32
    %25 = vector.broadcast %cst_22 : f32 to vector<2x96xf32>
    %26 = arith.addf %25, %24 : vector<2x96xf32>
    %27 = arith.divf %25, %26 : vector<2x96xf32>
    %28 = vector.extract_strided_slice %21 {offsets = [0, 96], sizes = [2, 32], strides = [1, 1]} : vector<2x128xf32> to vector<2x32xf32>
    %29 = math.tanh %28 : vector<2x32xf32>
    %30 = vector.extract_strided_slice %27 {offsets = [0, 0], sizes = [2, 32], strides = [1, 1]} : vector<2x96xf32> to vector<2x32xf32>
    %31 = vector.extract_strided_slice %27 {offsets = [0, 32], sizes = [2, 32], strides = [1, 1]} : vector<2x96xf32> to vector<2x32xf32>
    %32 = vector.extract_strided_slice %27 {offsets = [0, 64], sizes = [2, 32], strides = [1, 1]} : vector<2x96xf32> to vector<2x32xf32>
    %33 = arith.mulf %31, %16 : vector<2x32xf32>
    %34 = arith.mulf %30, %29 : vector<2x32xf32>
    %35 = arith.addf %33, %34 : vector<2x32xf32>
    %36 = math.tanh %35 : vector<2x32xf32>
    %37 = arith.mulf %32, %36 : vector<2x32xf32>
    %38 = arith.index_cast %c0_i32_18 : i32 to index
    %c0_23 = arith.constant 0 : index
    %c0_24 = arith.constant 0 : index
    %39 = vector.load %arg11[%38, %c0_23, %c0_24] : memref<4x2x32xf32, #tpu.memory_space<vmem>>, vector<1x2x32xf32>
    %40 = vector.shape_cast %39 : vector<1x2x32xf32> to vector<2x32xf32>
    %41 = vector.shape_cast %37 : vector<2x32xf32> to vector<1x2x32xf32>
    tpu.vector_store %arg11[%38, %c0_23, %c0_24], %41 {strides = array<i32>} : memref<4x2x32xf32, #tpu.memory_space<vmem>>, vector<1x2x32xf32>,
    %c1_i32 = arith.constant 1 : i32
    %42 = arith.index_cast %c1_i32 : i32 to index
    %c0_25 = arith.constant 0 : index
    %c0_26 = arith.constant 0 : index
    %43 = vector.load %arg12[%42, %c0_25, %c0_26] : memref<4x2x128xf32, #tpu.memory_space<vmem>>, vector<1x2x128xf32>
    %44 = vector.shape_cast %43 : vector<1x2x128xf32> to vector<2x128xf32>
    %cst_27 = arith.constant dense<0.000000e+00> : vector<2x128xf32>
    %45 = tpu.matmul %37, %5, %cst_27 {dimension_numbers = #tpu.dot_dimension_numbers<[1], [0], [0], [1], [0, 0, 1, 1], [], []>} : vector<2x32xf32>, vector<32x128xf32>, vector<2x128xf32> -> vector<2x128xf32>
    %46 = arith.addf %44, %45 : vector<2x128xf32>
    %47 = vector.extract_strided_slice %46 {offsets = [0, 0], sizes = [2, 96], strides = [1, 1]} : vector<2x128xf32> to vector<2x96xf32>
    %48 = arith.negf %47 : vector<2x96xf32>
    %49 = math.exp %48 : vector<2x96xf32>
    %cst_28 = arith.constant 1.000000e+00 : f32
    %50 = vector.broadcast %cst_28 : f32 to vector<2x96xf32>
    %51 = arith.addf %50, %49 : vector<2x96xf32>
    %52 = arith.divf %50, %51 : vector<2x96xf32>
    %53 = vector.extract_strided_slice %46 {offsets = [0, 96], sizes = [2, 32], strides = [1, 1]} : vector<2x128xf32> to vector<2x32xf32>
    %54 = math.tanh %53 : vector<2x32xf32>
    %55 = vector.extract_strided_slice %52 {offsets = [0, 0], sizes = [2, 32], strides = [1, 1]} : vector<2x96xf32> to vector<2x32xf32>
    %56 = vector.extract_strided_slice %52 {offsets = [0, 32], sizes = [2, 32], strides = [1, 1]} : vector<2x96xf32> to vector<2x32xf32>
    %57 = vector.extract_strided_slice %52 {offsets = [0, 64], sizes = [2, 32], strides = [1, 1]} : vector<2x96xf32> to vector<2x32xf32>
    %58 = arith.mulf %56, %35 : vector<2x32xf32>
    %59 = arith.mulf %55, %54 : vector<2x32xf32>
    %60 = arith.addf %58, %59 : vector<2x32xf32>
    %61 = math.tanh %60 : vector<2x32xf32>
    %62 = arith.mulf %57, %61 : vector<2x32xf32>
    %63 = arith.index_cast %c1_i32 : i32 to index
    %c0_29 = arith.constant 0 : index
    %c0_30 = arith.constant 0 : index
    %64 = vector.load %arg11[%63, %c0_29, %c0_30] : memref<4x2x32xf32, #tpu.memory_space<vmem>>, vector<1x2x32xf32>
    %65 = vector.shape_cast %64 : vector<1x2x32xf32> to vector<2x32xf32>
    %66 = vector.shape_cast %62 : vector<2x32xf32> to vector<1x2x32xf32>
    tpu.vector_store %arg11[%63, %c0_29, %c0_30], %66 {strides = array<i32>} : memref<4x2x32xf32, #tpu.memory_space<vmem>>, vector<1x2x32xf32>,
    %c2_i32 = arith.constant 2 : i32
    %67 = arith.index_cast %c2_i32 : i32 to index
    %c0_31 = arith.constant 0 : index
    %c0_32 = arith.constant 0 : index
    %68 = vector.load %arg12[%67, %c0_31, %c0_32] : memref<4x2x128xf32, #tpu.memory_space<vmem>>, vector<1x2x128xf32>
    %69 = vector.shape_cast %68 : vector<1x2x128xf32> to vector<2x128xf32>
    %cst_33 = arith.constant dense<0.000000e+00> : vector<2x128xf32>
    %70 = tpu.matmul %62, %5, %cst_33 {dimension_numbers = #tpu.dot_dimension_numbers<[1], [0], [0], [1], [0, 0, 1, 1], [], []>} : vector<2x32xf32>, vector<32x128xf32>, vector<2x128xf32> -> vector<2x128xf32>
    %71 = arith.addf %69, %70 : vector<2x128xf32>
    %72 = vector.extract_strided_slice %71 {offsets = [0, 0], sizes = [2, 96], strides = [1, 1]} : vector<2x128xf32> to vector<2x96xf32>
    %73 = arith.negf %72 : vector<2x96xf32>
    %74 = math.exp %73 : vector<2x96xf32>
    %cst_34 = arith.constant 1.000000e+00 : f32
    %75 = vector.broadcast %cst_34 : f32 to vector<2x96xf32>
    %76 = arith.addf %75, %74 : vector<2x96xf32>
    %77 = arith.divf %75, %76 : vector<2x96xf32>
    %78 = vector.extract_strided_slice %71 {offsets = [0, 96], sizes = [2, 32], strides = [1, 1]} : vector<2x128xf32> to vector<2x32xf32>
    %79 = math.tanh %78 : vector<2x32xf32>
    %80 = vector.extract_strided_slice %77 {offsets = [0, 0], sizes = [2, 32], strides = [1, 1]} : vector<2x96xf32> to vector<2x32xf32>
    %81 = vector.extract_strided_slice %77 {offsets = [0, 32], sizes = [2, 32], strides = [1, 1]} : vector<2x96xf32> to vector<2x32xf32>
    %82 = vector.extract_strided_slice %77 {offsets = [0, 64], sizes = [2, 32], strides = [1, 1]} : vector<2x96xf32> to vector<2x32xf32>
    %83 = arith.mulf %81, %60 : vector<2x32xf32>
    %84 = arith.mulf %80, %79 : vector<2x32xf32>
    %85 = arith.addf %83, %84 : vector<2x32xf32>
    %86 = math.tanh %85 : vector<2x32xf32>
    %87 = arith.mulf %82, %86 : vector<2x32xf32>
    %88 = arith.index_cast %c2_i32 : i32 to index
    %c0_35 = arith.constant 0 : index
    %c0_36 = arith.constant 0 : index
    %89 = vector.load %arg11[%88, %c0_35, %c0_36] : memref<4x2x32xf32, #tpu.memory_space<vmem>>, vector<1x2x32xf32>
    %90 = vector.shape_cast %89 : vector<1x2x32xf32> to vector<2x32xf32>
    %91 = vector.shape_cast %87 : vector<2x32xf32> to vector<1x2x32xf32>
    tpu.vector_store %arg11[%88, %c0_35, %c0_36], %91 {strides = array<i32>} : memref<4x2x32xf32, #tpu.memory_space<vmem>>, vector<1x2x32xf32>,
    %c3_i32 = arith.constant 3 : i32
    %92 = arith.index_cast %c3_i32 : i32 to index
    %c0_37 = arith.constant 0 : index
    %c0_38 = arith.constant 0 : index
    %93 = vector.load %arg12[%92, %c0_37, %c0_38] : memref<4x2x128xf32, #tpu.memory_space<vmem>>, vector<1x2x128xf32>
    %94 = vector.shape_cast %93 : vector<1x2x128xf32> to vector<2x128xf32>
    %cst_39 = arith.constant dense<0.000000e+00> : vector<2x128xf32>
    %95 = tpu.matmul %87, %5, %cst_39 {dimension_numbers = #tpu.dot_dimension_numbers<[1], [0], [0], [1], [0, 0, 1, 1], [], []>} : vector<2x32xf32>, vector<32x128xf32>, vector<2x128xf32> -> vector<2x128xf32>
    %96 = arith.addf %94, %95 : vector<2x128xf32>
    %97 = vector.extract_strided_slice %96 {offsets = [0, 0], sizes = [2, 96], strides = [1, 1]} : vector<2x128xf32> to vector<2x96xf32>
    %98 = arith.negf %97 : vector<2x96xf32>
    %99 = math.exp %98 : vector<2x96xf32>
    %cst_40 = arith.constant 1.000000e+00 : f32
    %100 = vector.broadcast %cst_40 : f32 to vector<2x96xf32>
    %101 = arith.addf %100, %99 : vector<2x96xf32>
    %102 = arith.divf %100, %101 : vector<2x96xf32>
    %103 = vector.extract_strided_slice %96 {offsets = [0, 96], sizes = [2, 32], strides = [1, 1]} : vector<2x128xf32> to vector<2x32xf32>
    %104 = math.tanh %103 : vector<2x32xf32>
    %105 = vector.extract_strided_slice %102 {offsets = [0, 0], sizes = [2, 32], strides = [1, 1]} : vector<2x96xf32> to vector<2x32xf32>
    %106 = vector.extract_strided_slice %102 {offsets = [0, 32], sizes = [2, 32], strides = [1, 1]} : vector<2x96xf32> to vector<2x32xf32>
    %107 = vector.extract_strided_slice %102 {offsets = [0, 64], sizes = [2, 32], strides = [1, 1]} : vector<2x96xf32> to vector<2x32xf32>
    %108 = arith.mulf %106, %85 : vector<2x32xf32>
    %109 = arith.mulf %105, %104 : vector<2x32xf32>
    %110 = arith.addf %108, %109 : vector<2x32xf32>
    %111 = math.tanh %110 : vector<2x32xf32>
    %112 = arith.mulf %107, %111 : vector<2x32xf32>
    %113 = arith.index_cast %c3_i32 : i32 to index
    %c0_41 = arith.constant 0 : index
    %c0_42 = arith.constant 0 : index
    %114 = vector.load %arg11[%113, %c0_41, %c0_42] : memref<4x2x32xf32, #tpu.memory_space<vmem>>, vector<1x2x32xf32>
    %115 = vector.shape_cast %114 : vector<1x2x32xf32> to vector<2x32xf32>
    %116 = vector.shape_cast %112 : vector<2x32xf32> to vector<1x2x32xf32>
    tpu.vector_store %arg11[%113, %c0_41, %c0_42], %116 {strides = array<i32>} : memref<4x2x32xf32, #tpu.memory_space<vmem>>, vector<1x2x32xf32>,
    %c4_i32 = arith.constant 4 : i32
    %c0_43 = arith.constant 0 : index
    %c0_44 = arith.constant 0 : index
    %c0_45 = arith.constant 0 : index
    %117 = vector.load %arg13[%c0_43, %c0_44, %c0_45] : memref<2x2x32xf32, #tpu.memory_space<vmem>>, vector<1x2x32xf32>
    %118 = vector.shape_cast %117 : vector<1x2x32xf32> to vector<2x32xf32>
    %119 = vector.shape_cast %112 : vector<2x32xf32> to vector<1x2x32xf32>
    tpu.vector_store %arg13[%c0_43, %c0_44, %c0_45], %119 {strides = array<i32>} : memref<2x2x32xf32, #tpu.memory_space<vmem>>, vector<1x2x32xf32>,
    %c0_46 = arith.constant 0 : index
    %c0_47 = arith.constant 0 : index
    %c0_48 = arith.constant 0 : index
    %120 = vector.load %arg14[%c0_46, %c0_47, %c0_48] : memref<2x2x32xf32, #tpu.memory_space<vmem>>, vector<1x2x32xf32>
    %121 = vector.shape_cast %120 : vector<1x2x32xf32> to vector<2x32xf32>
    %122 = vector.shape_cast %110 : vector<2x32xf32> to vector<1x2x32xf32>
    tpu.vector_store %arg14[%c0_46, %c0_47, %c0_48], %122 {strides = array<i32>} : memref<2x2x32xf32, #tpu.memory_space<vmem>>, vector<1x2x32xf32>,
    %c0_49 = arith.constant 0 : index
    %c0_50 = arith.constant 0 : index
    %c0_51 = arith.constant 0 : index
    %123 = vector.load %arg11[%c0_49, %c0_50, %c0_51] : memref<4x2x32xf32, #tpu.memory_space<vmem>>, vector<4x2x32xf32>
    %c0_52 = arith.constant 0 : index
    %c0_53 = arith.constant 0 : index
    %124 = vector.load %arg5[%c0_52, %c0_53] : memref<32x128xf32, #tpu.memory_space<vmem>>, vector<32x128xf32>
    %c0_54 = arith.constant 0 : index
    %c0_55 = arith.constant 0 : index
    %125 = vector.load %arg6[%c0_54, %c0_55] : memref<32x128xf32, #tpu.memory_space<vmem>>, vector<32x128xf32>
    %c0_56 = arith.constant 0 : index
    %c0_57 = arith.constant 0 : index
    %126 = vector.load %arg7[%c0_56, %c0_57] : memref<1x128xf32, #tpu.memory_space<vmem>>, vector<1x128xf32>
    %127 = vector.shape_cast %123 : vector<4x2x32xf32> to vector<8x32xf32>
    %cst_58 = arith.constant dense<0.000000e+00> : vector<8x128xf32>
    %128 = tpu.matmul %127, %124, %cst_58 {dimension_numbers = #tpu.dot_dimension_numbers<[1], [0], [0], [1], [0, 0, 1, 1], [], []>} : vector<8x32xf32>, vector<32x128xf32>, vector<8x128xf32> -> vector<8x128xf32>
    %129 = vector.broadcast %126 : vector<1x128xf32> to vector<8x128xf32>
    %130 = arith.addf %128, %129 : vector<8x128xf32>
    %131 = vector.shape_cast %130 : vector<8x128xf32> to vector<4x2x128xf32>
    %c0_59 = arith.constant 0 : index
    %c0_60 = arith.constant 0 : index
    %c0_61 = arith.constant 0 : index
    %132 = vector.load %arg12[%c0_59, %c0_60, %c0_61] : memref<4x2x128xf32, #tpu.memory_space<vmem>>, vector<4x2x128xf32>
    tpu.vector_store %arg12[%c0_59, %c0_60, %c0_61], %131 {strides = array<i32>} : memref<4x2x128xf32, #tpu.memory_space<vmem>>, vector<4x2x128xf32>,
    %c1 = arith.constant 1 : index
    %c0_62 = arith.constant 0 : index
    %c0_63 = arith.constant 0 : index
    %133 = vector.load %arg13[%c1, %c0_62, %c0_63] : memref<2x2x32xf32, #tpu.memory_space<vmem>>, vector<1x2x32xf32>
    %134 = vector.shape_cast %133 : vector<1x2x32xf32> to vector<2x32xf32>
    %c1_64 = arith.constant 1 : index
    %c0_65 = arith.constant 0 : index
    %c0_66 = arith.constant 0 : index
    %135 = vector.load %arg14[%c1_64, %c0_65, %c0_66] : memref<2x2x32xf32, #tpu.memory_space<vmem>>, vector<1x2x32xf32>
    %136 = vector.shape_cast %135 : vector<1x2x32xf32> to vector<2x32xf32>
    %c0_i32_67 = arith.constant 0 : i32
    %137 = arith.index_cast %c0_i32_67 : i32 to index
    %c0_68 = arith.constant 0 : index
    %c0_69 = arith.constant 0 : index
    %138 = vector.load %arg12[%137, %c0_68, %c0_69] : memref<4x2x128xf32, #tpu.memory_space<vmem>>, vector<1x2x128xf32>
    %139 = vector.shape_cast %138 : vector<1x2x128xf32> to vector<2x128xf32>
    %cst_70 = arith.constant dense<0.000000e+00> : vector<2x128xf32>
    %140 = tpu.matmul %134, %125, %cst_70 {dimension_numbers = #tpu.dot_dimension_numbers<[1], [0], [0], [1], [0, 0, 1, 1], [], []>} : vector<2x32xf32>, vector<32x128xf32>, vector<2x128xf32> -> vector<2x128xf32>
    %141 = arith.addf %139, %140 : vector<2x128xf32>
    %142 = vector.extract_strided_slice %141 {offsets = [0, 0], sizes = [2, 96], strides = [1, 1]} : vector<2x128xf32> to vector<2x96xf32>
    %143 = arith.negf %142 : vector<2x96xf32>
    %144 = math.exp %143 : vector<2x96xf32>
    %cst_71 = arith.constant 1.000000e+00 : f32
    %145 = vector.broadcast %cst_71 : f32 to vector<2x96xf32>
    %146 = arith.addf %145, %144 : vector<2x96xf32>
    %147 = arith.divf %145, %146 : vector<2x96xf32>
    %148 = vector.extract_strided_slice %141 {offsets = [0, 96], sizes = [2, 32], strides = [1, 1]} : vector<2x128xf32> to vector<2x32xf32>
    %149 = math.tanh %148 : vector<2x32xf32>
    %150 = vector.extract_strided_slice %147 {offsets = [0, 0], sizes = [2, 32], strides = [1, 1]} : vector<2x96xf32> to vector<2x32xf32>
    %151 = vector.extract_strided_slice %147 {offsets = [0, 32], sizes = [2, 32], strides = [1, 1]} : vector<2x96xf32> to vector<2x32xf32>
    %152 = vector.extract_strided_slice %147 {offsets = [0, 64], sizes = [2, 32], strides = [1, 1]} : vector<2x96xf32> to vector<2x32xf32>
    %153 = arith.mulf %151, %136 : vector<2x32xf32>
    %154 = arith.mulf %150, %149 : vector<2x32xf32>
    %155 = arith.addf %153, %154 : vector<2x32xf32>
    %156 = math.tanh %155 : vector<2x32xf32>
    %157 = arith.mulf %152, %156 : vector<2x32xf32>
    %158 = arith.index_cast %c0_i32_67 : i32 to index
    %c0_72 = arith.constant 0 : index
    %c0_73 = arith.constant 0 : index
    %159 = vector.load %arg11[%158, %c0_72, %c0_73] : memref<4x2x32xf32, #tpu.memory_space<vmem>>, vector<1x2x32xf32>
    %160 = vector.shape_cast %159 : vector<1x2x32xf32> to vector<2x32xf32>
    %161 = vector.shape_cast %157 : vector<2x32xf32> to vector<1x2x32xf32>
    tpu.vector_store %arg11[%158, %c0_72, %c0_73], %161 {strides = array<i32>} : memref<4x2x32xf32, #tpu.memory_space<vmem>>, vector<1x2x32xf32>,
    %c1_i32_74 = arith.constant 1 : i32
    %162 = arith.index_cast %c1_i32_74 : i32 to index
    %c0_75 = arith.constant 0 : index
    %c0_76 = arith.constant 0 : index
    %163 = vector.load %arg12[%162, %c0_75, %c0_76] : memref<4x2x128xf32, #tpu.memory_space<vmem>>, vector<1x2x128xf32>
    %164 = vector.shape_cast %163 : vector<1x2x128xf32> to vector<2x128xf32>
    %cst_77 = arith.constant dense<0.000000e+00> : vector<2x128xf32>
    %165 = tpu.matmul %157, %125, %cst_77 {dimension_numbers = #tpu.dot_dimension_numbers<[1], [0], [0], [1], [0, 0, 1, 1], [], []>} : vector<2x32xf32>, vector<32x128xf32>, vector<2x128xf32> -> vector<2x128xf32>
    %166 = arith.addf %164, %165 : vector<2x128xf32>
    %167 = vector.extract_strided_slice %166 {offsets = [0, 0], sizes = [2, 96], strides = [1, 1]} : vector<2x128xf32> to vector<2x96xf32>
    %168 = arith.negf %167 : vector<2x96xf32>
    %169 = math.exp %168 : vector<2x96xf32>
    %cst_78 = arith.constant 1.000000e+00 : f32
    %170 = vector.broadcast %cst_78 : f32 to vector<2x96xf32>
    %171 = arith.addf %170, %169 : vector<2x96xf32>
    %172 = arith.divf %170, %171 : vector<2x96xf32>
    %173 = vector.extract_strided_slice %166 {offsets = [0, 96], sizes = [2, 32], strides = [1, 1]} : vector<2x128xf32> to vector<2x32xf32>
    %174 = math.tanh %173 : vector<2x32xf32>
    %175 = vector.extract_strided_slice %172 {offsets = [0, 0], sizes = [2, 32], strides = [1, 1]} : vector<2x96xf32> to vector<2x32xf32>
    %176 = vector.extract_strided_slice %172 {offsets = [0, 32], sizes = [2, 32], strides = [1, 1]} : vector<2x96xf32> to vector<2x32xf32>
    %177 = vector.extract_strided_slice %172 {offsets = [0, 64], sizes = [2, 32], strides = [1, 1]} : vector<2x96xf32> to vector<2x32xf32>
    %178 = arith.mulf %176, %155 : vector<2x32xf32>
    %179 = arith.mulf %175, %174 : vector<2x32xf32>
    %180 = arith.addf %178, %179 : vector<2x32xf32>
    %181 = math.tanh %180 : vector<2x32xf32>
    %182 = arith.mulf %177, %181 : vector<2x32xf32>
    %183 = arith.index_cast %c1_i32_74 : i32 to index
    %c0_79 = arith.constant 0 : index
    %c0_80 = arith.constant 0 : index
    %184 = vector.load %arg11[%183, %c0_79, %c0_80] : memref<4x2x32xf32, #tpu.memory_space<vmem>>, vector<1x2x32xf32>
    %185 = vector.shape_cast %184 : vector<1x2x32xf32> to vector<2x32xf32>
    %186 = vector.shape_cast %182 : vector<2x32xf32> to vector<1x2x32xf32>
    tpu.vector_store %arg11[%183, %c0_79, %c0_80], %186 {strides = array<i32>} : memref<4x2x32xf32, #tpu.memory_space<vmem>>, vector<1x2x32xf32>,
    %c2_i32_81 = arith.constant 2 : i32
    %187 = arith.index_cast %c2_i32_81 : i32 to index
    %c0_82 = arith.constant 0 : index
    %c0_83 = arith.constant 0 : index
    %188 = vector.load %arg12[%187, %c0_82, %c0_83] : memref<4x2x128xf32, #tpu.memory_space<vmem>>, vector<1x2x128xf32>
    %189 = vector.shape_cast %188 : vector<1x2x128xf32> to vector<2x128xf32>
    %cst_84 = arith.constant dense<0.000000e+00> : vector<2x128xf32>
    %190 = tpu.matmul %182, %125, %cst_84 {dimension_numbers = #tpu.dot_dimension_numbers<[1], [0], [0], [1], [0, 0, 1, 1], [], []>} : vector<2x32xf32>, vector<32x128xf32>, vector<2x128xf32> -> vector<2x128xf32>
    %191 = arith.addf %189, %190 : vector<2x128xf32>
    %192 = vector.extract_strided_slice %191 {offsets = [0, 0], sizes = [2, 96], strides = [1, 1]} : vector<2x128xf32> to vector<2x96xf32>
    %193 = arith.negf %192 : vector<2x96xf32>
    %194 = math.exp %193 : vector<2x96xf32>
    %cst_85 = arith.constant 1.000000e+00 : f32
    %195 = vector.broadcast %cst_85 : f32 to vector<2x96xf32>
    %196 = arith.addf %195, %194 : vector<2x96xf32>
    %197 = arith.divf %195, %196 : vector<2x96xf32>
    %198 = vector.extract_strided_slice %191 {offsets = [0, 96], sizes = [2, 32], strides = [1, 1]} : vector<2x128xf32> to vector<2x32xf32>
    %199 = math.tanh %198 : vector<2x32xf32>
    %200 = vector.extract_strided_slice %197 {offsets = [0, 0], sizes = [2, 32], strides = [1, 1]} : vector<2x96xf32> to vector<2x32xf32>
    %201 = vector.extract_strided_slice %197 {offsets = [0, 32], sizes = [2, 32], strides = [1, 1]} : vector<2x96xf32> to vector<2x32xf32>
    %202 = vector.extract_strided_slice %197 {offsets = [0, 64], sizes = [2, 32], strides = [1, 1]} : vector<2x96xf32> to vector<2x32xf32>
    %203 = arith.mulf %201, %180 : vector<2x32xf32>
    %204 = arith.mulf %200, %199 : vector<2x32xf32>
    %205 = arith.addf %203, %204 : vector<2x32xf32>
    %206 = math.tanh %205 : vector<2x32xf32>
    %207 = arith.mulf %202, %206 : vector<2x32xf32>
    %208 = arith.index_cast %c2_i32_81 : i32 to index
    %c0_86 = arith.constant 0 : index
    %c0_87 = arith.constant 0 : index
    %209 = vector.load %arg11[%208, %c0_86, %c0_87] : memref<4x2x32xf32, #tpu.memory_space<vmem>>, vector<1x2x32xf32>
    %210 = vector.shape_cast %209 : vector<1x2x32xf32> to vector<2x32xf32>
    %211 = vector.shape_cast %207 : vector<2x32xf32> to vector<1x2x32xf32>
    tpu.vector_store %arg11[%208, %c0_86, %c0_87], %211 {strides = array<i32>} : memref<4x2x32xf32, #tpu.memory_space<vmem>>, vector<1x2x32xf32>,
    %c3_i32_88 = arith.constant 3 : i32
    %212 = arith.index_cast %c3_i32_88 : i32 to index
    %c0_89 = arith.constant 0 : index
    %c0_90 = arith.constant 0 : index
    %213 = vector.load %arg12[%212, %c0_89, %c0_90] : memref<4x2x128xf32, #tpu.memory_space<vmem>>, vector<1x2x128xf32>
    %214 = vector.shape_cast %213 : vector<1x2x128xf32> to vector<2x128xf32>
    %cst_91 = arith.constant dense<0.000000e+00> : vector<2x128xf32>
    %215 = tpu.matmul %207, %125, %cst_91 {dimension_numbers = #tpu.dot_dimension_numbers<[1], [0], [0], [1], [0, 0, 1, 1], [], []>} : vector<2x32xf32>, vector<32x128xf32>, vector<2x128xf32> -> vector<2x128xf32>
    %216 = arith.addf %214, %215 : vector<2x128xf32>
    %217 = vector.extract_strided_slice %216 {offsets = [0, 0], sizes = [2, 96], strides = [1, 1]} : vector<2x128xf32> to vector<2x96xf32>
    %218 = arith.negf %217 : vector<2x96xf32>
    %219 = math.exp %218 : vector<2x96xf32>
    %cst_92 = arith.constant 1.000000e+00 : f32
    %220 = vector.broadcast %cst_92 : f32 to vector<2x96xf32>
    %221 = arith.addf %220, %219 : vector<2x96xf32>
    %222 = arith.divf %220, %221 : vector<2x96xf32>
    %223 = vector.extract_strided_slice %216 {offsets = [0, 96], sizes = [2, 32], strides = [1, 1]} : vector<2x128xf32> to vector<2x32xf32>
    %224 = math.tanh %223 : vector<2x32xf32>
    %225 = vector.extract_strided_slice %222 {offsets = [0, 0], sizes = [2, 32], strides = [1, 1]} : vector<2x96xf32> to vector<2x32xf32>
    %226 = vector.extract_strided_slice %222 {offsets = [0, 32], sizes = [2, 32], strides = [1, 1]} : vector<2x96xf32> to vector<2x32xf32>
    %227 = vector.extract_strided_slice %222 {offsets = [0, 64], sizes = [2, 32], strides = [1, 1]} : vector<2x96xf32> to vector<2x32xf32>
    %228 = arith.mulf %226, %205 : vector<2x32xf32>
    %229 = arith.mulf %225, %224 : vector<2x32xf32>
    %230 = arith.addf %228, %229 : vector<2x32xf32>
    %231 = math.tanh %230 : vector<2x32xf32>
    %232 = arith.mulf %227, %231 : vector<2x32xf32>
    %233 = arith.index_cast %c3_i32_88 : i32 to index
    %c0_93 = arith.constant 0 : index
    %c0_94 = arith.constant 0 : index
    %234 = vector.load %arg11[%233, %c0_93, %c0_94] : memref<4x2x32xf32, #tpu.memory_space<vmem>>, vector<1x2x32xf32>
    %235 = vector.shape_cast %234 : vector<1x2x32xf32> to vector<2x32xf32>
    %236 = vector.shape_cast %232 : vector<2x32xf32> to vector<1x2x32xf32>
    tpu.vector_store %arg11[%233, %c0_93, %c0_94], %236 {strides = array<i32>} : memref<4x2x32xf32, #tpu.memory_space<vmem>>, vector<1x2x32xf32>,
    %c4_i32_95 = arith.constant 4 : i32
    %c1_96 = arith.constant 1 : index
    %c0_97 = arith.constant 0 : index
    %c0_98 = arith.constant 0 : index
    %237 = vector.load %arg13[%c1_96, %c0_97, %c0_98] : memref<2x2x32xf32, #tpu.memory_space<vmem>>, vector<1x2x32xf32>
    %238 = vector.shape_cast %237 : vector<1x2x32xf32> to vector<2x32xf32>
    %239 = vector.shape_cast %232 : vector<2x32xf32> to vector<1x2x32xf32>
    tpu.vector_store %arg13[%c1_96, %c0_97, %c0_98], %239 {strides = array<i32>} : memref<2x2x32xf32, #tpu.memory_space<vmem>>, vector<1x2x32xf32>,
    %c1_99 = arith.constant 1 : index
    %c0_100 = arith.constant 0 : index
    %c0_101 = arith.constant 0 : index
    %240 = vector.load %arg14[%c1_99, %c0_100, %c0_101] : memref<2x2x32xf32, #tpu.memory_space<vmem>>, vector<1x2x32xf32>
    %241 = vector.shape_cast %240 : vector<1x2x32xf32> to vector<2x32xf32>
    %242 = vector.shape_cast %230 : vector<2x32xf32> to vector<1x2x32xf32>
    tpu.vector_store %arg14[%c1_99, %c0_100, %c0_101], %242 {strides = array<i32>} : memref<2x2x32xf32, #tpu.memory_space<vmem>>, vector<1x2x32xf32>,
    %c1_i32_102 = arith.constant 1 : i32
    %243 = arith.cmpi eq, %arg0, %c1_i32_102 : i32
    %244 = arith.extui %243 : i1 to i32
    %c0_i32_103 = arith.constant 0 : i32
    %245 = arith.cmpi ne, %244, %c0_i32_103 : i32
    scf.if %245 {
      %c0_104 = arith.constant 0 : index
      %c0_105 = arith.constant 0 : index
      %246 = vector.load %arg8[%c0_104, %c0_105] : memref<32x3xf32, #tpu.memory_space<vmem>>, vector<32x3xf32>
      %c0_106 = arith.constant 0 : index
      %c0_107 = arith.constant 0 : index
      %247 = vector.load %arg9[%c0_106, %c0_107] : memref<1x3xf32, #tpu.memory_space<vmem>>, vector<1x3xf32>
      %c1_108 = arith.constant 1 : index
      %c0_109 = arith.constant 0 : index
      %c0_110 = arith.constant 0 : index
      %248 = vector.load %arg13[%c1_108, %c0_109, %c0_110] : memref<2x2x32xf32, #tpu.memory_space<vmem>>, vector<1x2x32xf32>
      %249 = vector.shape_cast %248 : vector<1x2x32xf32> to vector<2x32xf32>
      %cst_111 = arith.constant dense<0.000000e+00> : vector<2x3xf32>
      %250 = tpu.matmul %249, %246, %cst_111 {dimension_numbers = #tpu.dot_dimension_numbers<[1], [0], [0], [1], [0, 0, 1, 1], [], []>} : vector<2x32xf32>, vector<32x3xf32>, vector<2x3xf32> -> vector<2x3xf32>
      %251 = vector.broadcast %247 : vector<1x3xf32> to vector<2x3xf32>
      %252 = arith.addf %250, %251 : vector<2x3xf32>
      %c0_112 = arith.constant 0 : index
      %c0_113 = arith.constant 0 : index
      %253 = vector.load %arg10[%c0_112, %c0_113] : memref<2x3xf32, #tpu.memory_space<vmem>>, vector<2x3xf32>
      tpu.vector_store %arg10[%c0_112, %c0_113], %252 {strides = array<i32>} : memref<2x3xf32, #tpu.memory_space<vmem>>, vector<2x3xf32>,
    } else {
    }
    return
  }
  func.func @transform_0(%arg0: i32) -> (i32, i32, i32) {
    %c0_i32 = arith.constant 0 : i32
    %c0_i32_0 = arith.constant 0 : i32
    %c0_i32_1 = arith.constant 0 : i32
    return %arg0, %c0_i32, %c0_i32_0 : i32, i32, i32
  }
  func.func @transform_1(%arg0: i32) -> (i32, i32) {
    %c0_i32 = arith.constant 0 : i32
    %c0_i32_0 = arith.constant 0 : i32
    %c0_i32_1 = arith.constant 0 : i32
    return %c0_i32, %c0_i32_0 : i32, i32
  }
  func.func @transform_2(%arg0: i32) -> (i32, i32) {
    %c0_i32 = arith.constant 0 : i32
    %c0_i32_0 = arith.constant 0 : i32
    %c0_i32_1 = arith.constant 0 : i32
    return %c0_i32, %c0_i32_0 : i32, i32
  }
  func.func @transform_3(%arg0: i32) -> (i32, i32) {
    %c0_i32 = arith.constant 0 : i32
    %c0_i32_0 = arith.constant 0 : i32
    %c0_i32_1 = arith.constant 0 : i32
    return %c0_i32, %c0_i32_0 : i32, i32
  }
  func.func @transform_4(%arg0: i32) -> (i32, i32) {
    %c0_i32 = arith.constant 0 : i32
    %c0_i32_0 = arith.constant 0 : i32
    %c0_i32_1 = arith.constant 0 : i32
    return %c0_i32, %c0_i32_0 : i32, i32
  }
  func.func @transform_5(%arg0: i32) -> (i32, i32) {
    %c0_i32 = arith.constant 0 : i32
    %c0_i32_0 = arith.constant 0 : i32
    %c0_i32_1 = arith.constant 0 : i32
    return %c0_i32, %c0_i32_0 : i32, i32
  }
  func.func @transform_6(%arg0: i32) -> (i32, i32) {
    %c0_i32 = arith.constant 0 : i32
    %c0_i32_0 = arith.constant 0 : i32
    %c0_i32_1 = arith.constant 0 : i32
    return %c0_i32, %c0_i32_0 : i32, i32
  }
  func.func @transform_7(%arg0: i32) -> (i32, i32) {
    %c0_i32 = arith.constant 0 : i32
    %c0_i32_0 = arith.constant 0 : i32
    %c0_i32_1 = arith.constant 0 : i32
    return %c0_i32, %c0_i32_0 : i32, i32
  }
  func.func @transform_8(%arg0: i32) -> (i32, i32) {
    %c0_i32 = arith.constant 0 : i32
    %c0_i32_0 = arith.constant 0 : i32
    %c0_i32_1 = arith.constant 0 : i32
    return %c0_i32, %c0_i32_0 : i32, i32
  }
  func.func @transform_9(%arg0: i32) -> (i32, i32) {
    %c0_i32 = arith.constant 0 : i32
    %c0_i32_0 = arith.constant 0 : i32
    %c0_i32_1 = arith.constant 0 : i32
    return %c0_i32, %c0_i32_0 : i32, i32
  }
}

</mosaic_0001>

<bundles_post_ra>
// kernel: _lambda_.1
= control target key start
LH: loop header
LB: loop body
LE: loop exit
PB: predicated region body
PF: predicated region fallthrough
CT: control target
= control target key end

     0   :  { %14 = vsyncpa [#allocation7], 0  ;;  %s2501_s0 = inlined_call_operand.vmem [shape: f32[8,2,4], index: 0, kind: input, shape index: {}]   ;;  %s2502_s1 = inlined_call_operand.vmem [shape: f32[4,128], index: 1, kind: input, shape index: {}]   ;;  %s2503_s2 = inlined_call_operand.vmem [shape: f32[32,128], index: 2, kind: input, shape index: {}]   ;;  %s2504_s3 = inlined_call_operand.vmem [shape: f32[1,128], index: 3, kind: input, shape index: {}]   ;;  %s2505_s4 = inlined_call_operand.vmem [shape: f32[32,128], index: 4, kind: input, shape index: {}]   ;;  %s2506_s5 = inlined_call_operand.hbm [shape: f32[32,128], index: 5, kind: input, shape index: {}]   ;;  %s2507_s6 = inlined_call_operand.vmem [shape: f32[1,128], index: 6, kind: input, shape index: {}]   ;;  %s2508_s7 = inlined_call_operand.vmem [shape: f32[32,3], index: 7, kind: input, shape index: {}]   ;;  %s2509_s8 = inlined_call_operand.hbm [shape: f32[1,3], index: 8, kind: input, shape index: {}]   ;;  %s2510_s9 = inlined_call_operand.hbm [shape: f32[2,3], index: 9, kind: output, shape index: {}]  }
   0x1   :  { %15 = vsyncpa [#allocation10], 0 }
   0x2   :  { %16 = vsyncpa [#allocation8], 0  ;;  %s2206_s30 = smov 0  }
   0x3 LB: > { %s2212_s10 = sadd.s32 4294967295, %s2138_s30   ;;  %p1656_p0 = scmp.ge.s32.totalorder %s2138_s30, 1  ;;  %s2138_s30 = sphi %s2206_s30, %s22_s30  }
   0x4   : > { %p242_p1 = scmp.lt.s32.totalorder %s2138_s30, 3  ;;  %s2140_s11 = smov [#allocation6]  }
   0x5   : > { %s266_s12 = sshll.u32 %s2140_s11, 4  ;;  %p2511_p4 = scmp.eq.s32.totalorder %s2212_s10, 0  ;;  %s267_s12 = int_to_ptr.vmem [resolvable:$true] %s266_s12 }
   0x6   : > { %p2217_p3 = pnand %p1656_p0, %p242_p1  ;;  %s2141_s14 = smov [#allocation9]  }
   0x7   : > { %s286_s15 = sshll.u32 %s2141_s14, 4  ;;  %s2038_s19 = scalar_lea.hbm %s2506_s5, 512  ;;  %s2230_s15 = int_to_ptr.vmem [resolvable:$true] %s286_s15 }
   0x8   : > { %s2513_s13 = scalar_select %p2217_p3, 1, 0 }
   0x9   : > { %p1937_p5 = pneg %p2217_p3  ;;  %p2039_p7 = scmp.ne.s32.totalorder %s2506_s5, %s2038_s19 }
   0xa   : > { %p2045_p11 = scmp.lt.u32.totalorder %s2038_s19, %s2506_s5 }
   0xb   : > { %p2226_p6 = pnand %p2511_p4, %p1937_p5 }
   0xd   : > { %p2040_p8 = pneg %p2226_p6 }
   0xf   : > { %p2041_p9 = pnand %p2040_p8, %p2039_p7 }
  0x11   : > { %p2042_p10 = pneg %p2041_p9 }
  0x13   : > { %p2047_p12 = pnand %p2045_p11, %p2042_p10 }
  0x15   : > { %2050 = shalt.err (!%p2047_p12)
}
  0x16   : > { %s2051_s24 = scalar_lea.vmem %s267_s12, 512  ;;  %p2059_p5 = scmp.lt.s32.totalorder %s267_s12, %s267_s12 }
  0x17   : > { %p2052_p13 = scmp.ne.s32.totalorder %s267_s12, %s2051_s24  ;;  %p2060_p2 = scmp.lt.s32.totalorder %s2051_s24, %s2051_s24 }
  0x19   : > { %p2054_p0 = pnand %p2052_p13, %p2040_p8  ;;  %p2061_p4 = por %p2060_p2, %p2059_p5 }
  0x1b   : > { %p2055_p1 = pneg %p2054_p0 }
  0x1d   : > { %p2062_p3 = pnand %p2061_p4, %p2055_p1 }
  0x1f   : > { %2065 = shalt.err (!%p2062_p3)
}
  0x20   : > { %s2142_s25 = smov 128   ;;  %s2143_s26 = smov 8  }
  0x21   : > { %1940 = dma.hbm_to_vmem [thread:$0]  (!%p2226_p6), %s2506_s5, 512, %s267_s12, [#allocation7], %s2142_s25, %s2142_s25, %s2143_s26  }
  0x22   : > { %s2066_s14 = scalar_lea.hbm %s2509_s8, 16 }
  0x23   : > { %p2067_p7 = scmp.ne.s32.totalorder %s2509_s8, %s2066_s14  ;;  %p2073_p4 = scmp.lt.u32.totalorder %s2066_s14, %s2509_s8 }
  0x25   : > { %p2069_p2 = pnand %p2067_p7, %p2040_p8 }
  0x27   : > { %p2070_p3 = pneg %p2069_p2 }
  0x29   : > { %p2075_p9 = pnand %p2073_p4, %p2070_p3 }
  0x2b   : > { %2078 = shalt.err (!%p2075_p9)
}
  0x2c   : > { %s2079_s12 = scalar_lea.vmem %s2230_s15, 16  ;;  %s2086_s21 = scalar_lea.vmem %s2230_s15, 32 }
  0x2d   : > { %p2080_p10 = scmp.ne.s32.totalorder %s2230_s15, %s2079_s12  ;;  %p2087_p13 = scmp.lt.s32.totalorder %s2230_s15, %s2230_s15 }
  0x2e   : > { %p2088_p0 = scmp.lt.s32.totalorder %s2086_s21, %s2079_s12 }
  0x2f   : > { %p2082_p11 = pnand %p2080_p10, %p2040_p8 }
  0x30   : > { %p2089_p1 = por %p2088_p0, %p2087_p13 }
  0x31   : > { %p2083_p12 = pneg %p2082_p11 }
  0x33   : > { %p2090_p5 = pnand %p2089_p1, %p2083_p12 }
  0x35   : > { %2093 = shalt.err (!%p2090_p5)
}
  0x36   : > { %1943 = dma.hbm_to_vmem [thread:$0]  (!%p2226_p6), %s2509_s8, 16, %s2230_s15, [#allocation10]  }
  0x37   : > { %p2515_p7 = scmp.ne.s32.totalorder %s2513_s13, 0 }
  0x38   : > { %p2516_p8 = scmp.eq.s32.totalorder (!%p2515_p7), %s2212_s10, 0 }
  0x39   : > { %308 = sbr.rel (%p2515_p7) target bundleno = 5989 (0x1765), region = 56 }
  0x40   : > { %2125 = dma.done.wait (%p2516_p8), [#allocation7], 512   ;;  %p2517_p2 = pmov %p2516_p8 }
  0x42   : > { %2127 = vsyncadd (%p2517_p2), [#allocation7], 4294966784  ;;  %p2518_p3 = pmov %p2517_p2 }
  0x43   : > { %p2519_p4 = pmov %p2517_p2 }
  0x44   : > { %2129 = dma.done.wait (%p2518_p3), [#allocation10], 16  }
  0x45   : > { %2131 = vsyncadd (%p2519_p4), [#allocation10], 4294967280  ;;  %s1663_s16 = sshll.u32 %s2212_s10, 2  ;;  %p2520_p6 = scmp.ne.s32.totalorder %s2212_s10, 0 }
  0x46   : > { %p344_p9 = scmp.lt.s32.totalorder %s1663_s16, 7  ;;  %vm353_vm0 = vcmask (!%p2520_p6), 254976   ;;  %v2144_v0 = vmov (!%p2520_p6), 0.0  }
  0x47   : > { %352 = sbr.rel (%p2520_p6) target bundleno = 78 (0x4e), region = 68  ;;  %354 = vst.msk [vmem:[#allocation4] sm:$0x3] (!%p2520_p6), %vm353_vm0, %v2144_v0  ;;  %355 = vst.msk [vmem:[#allocation4 + $0x2] sm:$0x3] (!%p2520_p6), %vm353_vm0, %v2144_v0 }
  0x48   : > { %s2522_s16 = smov (!%p344_p9, %s1663_s16), 7  ;;  %356 = vst.msk [vmem:[#allocation5] sm:$0x3] (!%p2520_p6), %vm353_vm0, %v2144_v0  ;;  %357 = vst.msk [vmem:[#allocation5 + $0x2] sm:$0x3] (!%p2520_p6), %vm353_vm0, %v2144_v0 }
  0x49   : > { %s1664_s15 = sshll.u32 %s2522_s16, 1 }
  0x4a   : > { %s347_s25 = scalar_lea.vmem %s2501_s0, %s1664_s15 }
  0x4e PF: > { %v362_v1 = vld [vmem:[%s2502_s1] sm:$0xf]  ;;  %vm398_vm1 = vcmask 1043456   ;;  %v383_v2 = vlaneseq  ;;  %v2145_v3 = vmov 0.0   ;;  %vm2146_vm2 = vmmov 0   ;;  %v364_v12 = vld [vmem:[%s2503_s2 + $0x8] sm:$0xff] }
  0x4f   : > { %1750 = vmatprep.subr.mxu0 %v2145_v3  ;;  %1752 = vmatprep.mubr.msk.f32.mxu0 %vm2146_vm2, %v2145_v3  ;;  %v358_v4 = vld [vmem:[%s347_s25] sm:$0x3]  ;;  %v359_v5 = vld [vmem:[%s347_s25 + $0x2] sm:$0x3]  ;;  %v360_v7 = vld [vmem:[%s347_s25 + $0x4] sm:$0x3] }
  0x50   : > { %v363_v6 = vld [vmem:[%s2503_s2] sm:$0xff]  ;;  %1751 = vmatpush3.msk.msra.mxu0 %vm398_vm1, %v362_v1  ;;  %1763 = vmatprep.mubr.msk.f32.mxu1 %vm2146_vm2, %v2145_v3  ;;  %v2147_v9 = vmov 1983009808   ;;  %v384_v11 = vshrl.u32 %v383_v2, 7  ;;  %v365_v13 = vld [vmem:[%s2503_s2 + $0x10] sm:$0xff]  ;;  %v366_v14 = vld [vmem:[%s2503_s2 + $0x18] sm:$0xff]  ;;  %v378_v17 = vcombine.low %v358_v4, %v359_v5 }
  0x51   : > { %v361_v8 = vld [vmem:[%s347_s25 + $0x6] sm:$0x3]  ;;  %v381_v10 = vunpack.c.l.s4 %v2147_v9  ;;  %v2148_v15 = vmov 0.0|0.0   ;;  %v2317_v16 = vpack.c.bf16 %v364_v12, %v363_v6  ;;  %v2321_v20 = vpack.c.bf16 %v366_v14, %v365_v13  ;;  %v498_v24 = vld [vmem:[#allocation4] sm:$0x3]  ;;  %s2149_s22 = smov 32  }
  0x52   : > { %1865 = vmatprep.subr.bf16.mxu1 %v2148_v15  ;;  %1871 = vmatprep.subr.bf16.mxu0 %v2148_v15  ;;  %v379_v18 = vcombine.low %v360_v7, %v361_v8  ;;  %vm395_vm3 = vcmask 31744   ;;  %vm501_vm4 = vcmask 261120   ;;  %v1666_v26 = vld [vmem:[%s2504_s3] ss:$0 sm:$0xff]  ;;  %v499_v40 = vld [vmem:[#allocation5] sm:$0x3] }
  0x53   : > { %v382_v19 = vunpack.c.0.s8 %v381_v10  ;;  %1867 = vmatpush3.bf16.msra.mxu1 %v2317_v16  ;;  %s2150_s23 = smov 64   ;;  %vm608_vm5 = vcmask 254976   ;;  %s2151_s14 = smov 96  }
  0x54   : > { %1868 = vmatprep.subr.bf16.mxu1 %v2148_v15  ;;  %p1691_p10 = scmp.ne.s32.totalorder %s2212_s10, 1 }
  0x55   : > { %v2323_v21 = vsub.s32 %v382_v19, %v384_v11  ;;  %vm2153_vm6 = vmmov (!%p1691_p10), 0   ;;  %vm1585_vm7 = vcmask (!%p1691_p10), 17408  }
  0x57   : > { %v386_v22 = vrot.slane %v378_v17, %v2323_v21  ;;  %v393_v23 = vrot.slane %v379_v18, %v2323_v21  ;;  %1870 = vmatpush3.bf16.msra.mxu1 %v2321_v20 }
  0x58   : > { %1877 = vmatprep.subr.bf16.mxu1 %v2148_v15 }
  0x59   : > { %v394_v25 = vcombine.low %v386_v22, %v393_v23 }
  0x5a   : > { %1764 = vmatmul.mubr.msk.f32.vlgmr.msra.gmra.mrb[0].mxu1 %vm501_vm4, %v498_v24 }
  0x5b   : > { %1753 = vmatmul.mubr.msk.f32.vlgmr.msra.gmra.mrb[0].mxu0 %vm395_vm3, %v394_v25  ;;  %1879 = vmatpush3.bf16.msra.mxu1 %v2317_v16 }
  0x5c   : > { %1873 = vmatpush3.bf16.msra.mxu0 %v2317_v16  ;;  %1774 = vmatprep.mubr.msk.f32.mxu0 %vm2146_vm2, %v2145_v3 }
  0x5d   : > { %1874 = vmatprep.subr.bf16.mxu0 %v2148_v15  ;;  %1880 = vmatprep.subr.bf16.mxu1 %v2148_v15 }
  0x5e   : > { %1785 = vmatprep.mubr.msk.f32.mxu1 %vm2146_vm2, %v2145_v3 }
  0x5f   : > { %1882 = vmatpush3.bf16.msra.mxu1 %v2321_v20 }
  0x60   : > { %1876 = vmatpush3.bf16.msra.mxu0 %v2321_v20  ;;  %1889 = vmatprep.subr.bf16.mxu1 %v2148_v15 }
  0x61   : > { %1883 = vmatprep.subr.bf16.mxu0 %v2148_v15 }
 0x12d   : > { %v571_v28 = vpop.f32.mrb[0].mxu1 }
 0x12e   : > { %v468_v27 = vpop.f32.mrb[0].mxu0  ;;  %v1765_v31 = vpop.f32.mrb[1].mxu1 }
 0x12f   : > { %v469_v29 = vadd.f32 %v1666_v26, %v468_v27  ;;  %v1754_v30 = vpop.f32.mrb[1].mxu0 }
 0x131   : > { %v473_v32 = vcombine.high %v469_v29, %v469_v29  ;;  %v480_v33 = vrot.slane %v469_v29, %v2323_v21  ;;  %1669 = vst.sshfl [vmem:[#allocation3] sm:$0x3 pattern:$0x76325410] %v469_v29 }
 0x133   : > { %v487_v34 = vrot.slane %v473_v32, %v2323_v21  ;;  %v488_v35 = vcombine.high %v480_v33, %v480_v33  ;;  %1670 = vst.sshfl [vmem:[#allocation3 + $0x4] sm:$0x3 pattern:$0x76325410] %v473_v32 }
 0x135   : > { %v489_v36 = vcombine.high %v487_v34, %v487_v34  ;;  %495 = vst [vmem:[#allocation3 + $0x2] sm:$0x3] %v488_v35 }
 0x137   : > { %497 = vst [vmem:[#allocation3 + $0x6] sm:$0x3] %v489_v36 }
 0x138   : > { %v500_v37 = vld [vmem:[#allocation3] sm:$0x3] }
 0x139   : > { %v575_v38 = vadd.f32 %v571_v28, %v500_v37 }
 0x13a   : > { %v716_v10 = vld [vmem:[#allocation3 + $0x4] sm:$0x3] }
 0x13b   : > { %1974 = vtanh.f32 %v575_v38  ;;  %v1672_v41 = vmul.f32 -1.442695, %v575_v38 }
 0x13c   : > { %v611_v55 = vld [vmem:[#allocation3 + $0x2] sm:$0x3] }
 0x13d   : > { %1976 = vpow2.f32 %v1672_v41 }
 0x13e   : > { %v821_v30 = vld [vmem:[#allocation3 + $0x6] sm:$0x3] }
 0x145   : > { %v1975_v39 = vpop.eup %1974 }
 0x146   : > { %589 = vrot.lane.b32.xlu0 %v1975_v39, %s2149_s22 }
 0x147   : > { %v1977_v42 = vpop.eup %1976 }
 0x148   : > { %v579_v43 = vadd.f32 1.0, %v1977_v42 }
 0x14a   : > { %584 = vrot.lane.b32.xlu0 %v499_v40, %s2149_s22  ;;  %1978 = vrcp.f32 %v579_v43 }
 0x154   : > { %v1979_v44 = vpop.eup %1978 }
 0x1b8   : > { %v590_v45 = vpop.permute.xlu0 %589 }
 0x1b9   : > { %v592_v46 = vmul.f32 %v1979_v44, %v590_v45  ;;  %v935_v45 = vld [vmem:[%s2505_s4] sm:$0xff] }
 0x1bb   : > { %594 = vrot.lane.b32.xlu1 %v592_v46, %s2149_s22  ;;  %v936_v46 = vld [vmem:[%s2505_s4 + $0x8] sm:$0xff] }
 0x1bc   : > { %v585_v47 = vpop.permute.xlu0 %584 }
 0x1bd   : > { %v587_v48 = vmul.f32 %v1979_v44, %v585_v47  ;;  %v937_v47 = vld [vmem:[%s2505_s4 + $0x10] sm:$0xff] }
 0x22d   : > { %v595_v49 = vpop.permute.xlu1 %594 }
 0x22e   : > { %v597_v50 = vadd.f32 %v595_v49, %v587_v48  ;;  %v1890_v48 = vpack.c.bf16 %v936_v46, %v935_v45  ;;  %v938_v49 = vld [vmem:[%s2505_s4 + $0x18] sm:$0xff] }
 0x230   : > { %1980 = vtanh.f32 %v597_v50 }
 0x23a   : > { %v1981_v51 = vpop.eup %1980 }
 0x23b   : > { %600 = vrot.lane.b32.xlu1 %v1981_v51, %s2149_s22 }
 0x2ad   : > { %v601_v52 = vpop.permute.xlu1 %600 }
 0x2ae   : > { %v603_v53 = vmul.f32 %v1979_v44, %v601_v52 }
 0x2b0   : > { %605 = vrot.lane.b32.xlu0 %v603_v53, %s2150_s23  ;;  %v939_v53 = vld [vmem:[#allocation6] sm:$0xff] }
 0x322   : > { %v606_v54 = vpop.permute.xlu0 %605 }
 0x323   : > { %609 = vst.msk [vmem:[#allocation2] sm:$0x3] %vm608_vm5, %v606_v54  ;;  %1775 = vmatmul.mubr.msk.f32.vlgmr.msra.gmra.mrb[2].mxu0 %vm501_vm4, %v606_v54  ;;  %v940_v54 = vld [vmem:[#allocation6 + $0x8] sm:$0xff] }
 0x324   : > { %1885 = vmatpush3.bf16.msra.mxu0 %v2317_v16  ;;  %1796 = vmatprep.mubr.msk.f32.mxu0 %vm2146_vm2, %v2145_v3 }
 0x325   : > { %1886 = vmatprep.subr.bf16.mxu0 %v2148_v15 }
 0x328   : > { %1888 = vmatpush3.bf16.msra.mxu0 %v2321_v20 }
 0x329   : > { %1895 = vmatprep.subr.bf16.mxu0 %v2148_v15 }
 0x3f6   : > { %v680_v56 = vpop.f32.mrb[2].mxu0 }
 0x3f7   : > { %v684_v57 = vadd.f32 %v680_v56, %v611_v55  ;;  %v1776_v58 = vpop.f32.mrb[3].mxu0  ;;  %v2398_v55 = vpack.c.bf16 %v940_v54, %v939_v53  ;;  %v941_v56 = vld [vmem:[#allocation6 + $0x10] sm:$0xff] }
 0x3f8   : > { %v1072_v58 = vld [vmem:[#allocation5 + $0x2] sm:$0x3] }
 0x3f9   : > { %1982 = vtanh.f32 %v684_v57  ;;  %v1674_v60 = vmul.f32 -1.442695, %v684_v57  ;;  %v942_v57 = vld [vmem:[#allocation6 + $0x18] sm:$0xff] }
 0x3fb   : > { %1984 = vpow2.f32 %v1674_v60  ;;  %v1070_v60 = vld [vmem:[#allocation4 + $0x2] sm:$0x3] }
 0x403   : > { %v1983_v59 = vpop.eup %1982 }
 0x404   : > { %694 = vrot.lane.b32.xlu1 %v1983_v59, %s2149_s22  ;;  %v2401_v59 = vpack.c.bf16 %v942_v57, %v941_v56 }
 0x405   : > { %v1985_v61 = vpop.eup %1984 }
 0x406   : > { %v688_v62 = vadd.f32 1.0, %v1985_v61 }
 0x408   : > { %1986 = vrcp.f32 %v688_v62 }
 0x412   : > { %v1987_v63 = vpop.eup %1986 }
 0x413   : > { %v692_v2 = vmul.f32 %v1987_v63, %v597_v50  ;;  %v1893_v50 = vpack.c.bf16 %v938_v49, %v937_v47 }
 0x476   : > { %v695_v0 = vpop.permute.xlu1 %694 }
 0x477   : > { %v697_v1 = vmul.f32 %v1987_v63, %v695_v0 }
 0x479   : > { %699 = vrot.lane.b32.xlu0 %v697_v1, %s2149_s22 }
 0x4eb   : > { %v700_v4 = vpop.permute.xlu0 %699 }
 0x4ec   : > { %v702_v5 = vadd.f32 %v700_v4, %v692_v2 }
 0x4ee   : > { %1988 = vtanh.f32 %v702_v5 }
 0x4f8   : > { %v1989_v6 = vpop.eup %1988 }
 0x4f9   : > { %705 = vrot.lane.b32.xlu1 %v1989_v6, %s2149_s22 }
 0x56b   : > { %v706_v7 = vpop.permute.xlu1 %705 }
 0x56c   : > { %v708_v8 = vmul.f32 %v1987_v63, %v706_v7  ;;  %v931_v63 = vld [vmem:[#allocation2] sm:$0x3] }
 0x56e   : > { %710 = vrot.lane.b32.xlu0 %v708_v8, %s2150_s23 }
 0x5e0   : > { %v711_v9 = vpop.permute.xlu0 %710 }
 0x5e1   : > { %714 = vst.msk [vmem:[#allocation2 + $0x2] sm:$0x3] %vm608_vm5, %v711_v9  ;;  %1786 = vmatmul.mubr.msk.f32.vlgmr.msra.gmra.mrb[2].mxu1 %vm501_vm4, %v711_v9 }
 0x5e2   : > { %1807 = vmatprep.mubr.msk.f32.mxu1 %vm2146_vm2, %v2145_v3  ;;  %1891 = vmatpush3.bf16.msra.mxu1 %v1890_v48 }
 0x5e3   : > { %1892 = vmatprep.subr.bf16.mxu1 %v2148_v15 }
 0x5e6   : > { %1894 = vmatpush3.bf16.msra.mxu1 %v1893_v50 }
 0x5e7   : > { %1901 = vmatprep.subr.bf16.mxu1 %v2148_v15 }
 0x5e8   : > { %v932_v62 = vld [vmem:[#allocation2 + $0x2] sm:$0x3] }
 0x5e9   : > { %v954_v0 = vcombine.low %v931_v63, %v932_v62 }
 0x6b4   : > { %v785_v11 = vpop.f32.mrb[2].mxu1 }
 0x6b5   : > { %v789_v12 = vadd.f32 %v785_v11, %v716_v10  ;;  %v1787_v13 = vpop.f32.mrb[3].mxu1  ;;  %v1679_v10 = vld [vmem:[%s2507_s6] ss:$0 sm:$0xff] }
 0x6b7   : > { %1990 = vtanh.f32 %v789_v12  ;;  %v1676_v16 = vmul.f32 -1.442695, %v789_v12 }
 0x6b9   : > { %1992 = vpow2.f32 %v1676_v16 }
 0x6c1   : > { %v1991_v14 = vpop.eup %1990 }
 0x6c2   : > { %799 = vrot.lane.b32.xlu1 %v1991_v14, %s2149_s22 }
 0x6c3   : > { %v1993_v17 = vpop.eup %1992 }
 0x6c4   : > { %v793_v18 = vadd.f32 1.0, %v1993_v17 }
 0x6c6   : > { %1994 = vrcp.f32 %v793_v18 }
 0x6d0   : > { %v1995_v19 = vpop.eup %1994 }
 0x6d1   : > { %v797_v23 = vmul.f32 %v1995_v19, %v702_v5  ;;  %v962_v5 = vrot.slane %v954_v0, %v2323_v21 }
 0x734   : > { %v800_v20 = vpop.permute.xlu1 %799 }
 0x735   : > { %v802_v22 = vmul.f32 %v1995_v19, %v800_v20 }
 0x737   : > { %804 = vrot.lane.b32.xlu0 %v802_v22, %s2149_s22 }
 0x7a9   : > { %v805_v24 = vpop.permute.xlu0 %804 }
 0x7aa   : > { %v807_v25 = vadd.f32 %v805_v24, %v797_v23 }
 0x7ac   : > { %1996 = vtanh.f32 %v807_v25 }
 0x7b6   : > { %v1997_v26 = vpop.eup %1996 }
 0x7b7   : > { %810 = vrot.lane.b32.xlu1 %v1997_v26, %s2149_s22 }
 0x829   : > { %v811_v27 = vpop.permute.xlu1 %810 }
 0x82a   : > { %v813_v28 = vmul.f32 %v1995_v19, %v811_v27 }
 0x82c   : > { %815 = vrot.lane.b32.xlu0 %v813_v28, %s2150_s23 }
 0x89e   : > { %v816_v29 = vpop.permute.xlu0 %815 }
 0x89f   : > { %819 = vst.msk [vmem:[#allocation2 + $0x4] sm:$0x3] %vm608_vm5, %v816_v29  ;;  %1797 = vmatmul.mubr.msk.f32.vlgmr.msra.gmra.mrb[4].mxu0 %vm501_vm4, %v816_v29 }
 0x8a0   : > { %1818 = vmatprep.mubr.msk.f32.mxu0 %vm2146_vm2, %v2145_v3  ;;  %1897 = vmatpush3.bf16.msra.mxu0 %v2398_v55 }
 0x8a1   : > { %1898 = vmatprep.subr.bf16.mxu0 %v2148_v15 }
 0x8a4   : > { %1900 = vmatpush3.bf16.msra.mxu0 %v2401_v59 }
 0x8a5   : > { %1907 = vmatprep.subr.bf16.mxu0 %v2148_v15 }
 0x8a6   : > { %v933_v1 = vld [vmem:[#allocation2 + $0x4] sm:$0x3] }
 0x8a7   : > { %1819 = vmatmul.mubr.msk.f32.vlgmr.msra.gmra.mrb[6].mxu0 %vm501_vm4, %v1070_v60 }
 0x8a8   : > { %1909 = vmatpush3.bf16.msra.mxu0 %v2398_v55  ;;  %1840 = vmatprep.mubr.msk.f32.mxu0 %vm2146_vm2, %v2145_v3 }
 0x8a9   : > { %1910 = vmatprep.subr.bf16.mxu0 %v2148_v15 }
 0x8ac   : > { %1912 = vmatpush3.bf16.msra.mxu0 %v2401_v59 }
 0x972   : > { %v890_v31 = vpop.f32.mrb[4].mxu0 }
 0x973   : > { %v894_v32 = vadd.f32 %v890_v31, %v821_v30  ;;  %v1798_v33 = vpop.f32.mrb[5].mxu0 }
 0x975   : > { %1998 = vtanh.f32 %v894_v32  ;;  %v1678_v35 = vmul.f32 -1.442695, %v894_v32 }
 0x977   : > { %2000 = vpow2.f32 %v1678_v35 }
 0x97a   : > { %v1143_v8 = vpop.f32.mrb[6].mxu0 }
 0x97b   : > { %v1820_v9 = vpop.f32.mrb[7].mxu0 }
 0x97f   : > { %v1999_v34 = vpop.eup %1998 }
 0x980   : > { %904 = vrot.lane.b32.xlu1 %v1999_v34, %s2149_s22 }
 0x981   : > { %v2001_v36 = vpop.eup %2000 }
 0x982   : > { %v898_v37 = vadd.f32 1.0, %v2001_v36 }
 0x984   : > { %2002 = vrcp.f32 %v898_v37 }
 0x98e   : > { %v2003_v38 = vpop.eup %2002 }
 0x98f   : > { %v902_v41 = vmul.f32 %v2003_v38, %v807_v25 }
 0x9f2   : > { %v905_v39 = vpop.permute.xlu1 %904 }
 0x9f3   : > { %v907_v40 = vmul.f32 %v2003_v38, %v905_v39 }
 0x9f5   : > { %909 = vrot.lane.b32.xlu0 %v907_v40, %s2149_s22 }
 0xa67   : > { %v910_v42 = vpop.permute.xlu0 %909 }
 0xa68   : > { %v2379_v43 = vadd.f32 %v910_v42, %v902_v41 }
 0xa6a   : > { %2004 = vtanh.f32 %v2379_v43 }
 0xa74   : > { %v2005_v44 = vpop.eup %2004 }
 0xa75   : > { %915 = vrot.lane.b32.xlu1 %v2005_v44, %s2149_s22 }
 0xae7   : > { %v916_v51 = vpop.permute.xlu1 %915 }
 0xae8   : > { %v918_v52 = vmul.f32 %v2003_v38, %v916_v51 }
 0xaea   : > { %920 = vrot.lane.b32.xlu0 %v918_v52, %s2150_s23 }
 0xaee   : > { %1156 = vrot.lane.b32.xlu0 %v1072_v58, %s2149_s22 }
 0xb5c   : > { %v921_v61 = vpop.permute.xlu0 %920 }
 0xb5d   : > { %924 = vst.msk [vmem:[#allocation2 + $0x6] sm:$0x3] %vm608_vm5, %v921_v61  ;;  %925 = vst.msk [vmem:[#allocation4] sm:$0x3] %vm608_vm5, %v921_v61 }
 0xb64   : > { %v934_v2 = vld [vmem:[#allocation2 + $0x6] sm:$0x3] }
 0xb65   : > { %v955_v4 = vcombine.low %v933_v1, %v934_v2 }
 0xb67   : > { %v969_v6 = vrot.slane %v955_v4, %v2323_v21 }
 0xb69   : > { %v970_v7 = vcombine.low %v962_v5, %v969_v6 }
 0xb6b   : > { %1808 = vmatmul.mubr.msk.f32.vlgmr.msra.gmra.mrb[4].mxu1 %vm501_vm4, %v970_v7 }
 0xb6c   : > { %1903 = vmatpush3.bf16.msra.mxu1 %v2398_v55  ;;  %1829 = vmatprep.mubr.msk.f32.mxu1 %vm2146_vm2, %v2145_v3 }
 0xb6d   : > { %1904 = vmatprep.subr.bf16.mxu1 %v2148_v15 }
 0xb70   : > { %1906 = vmatpush3.bf16.msra.mxu1 %v2401_v59 }
 0xb71   : > { %1913 = vmatprep.subr.bf16.mxu1 %v2148_v15 }
 0xc3e   : > { %v1039_v11 = vpop.f32.mrb[4].mxu1 }
 0xc3f   : > { %v1040_v12 = vadd.f32 %v1679_v10, %v1039_v11  ;;  %v1809_v13 = vpop.f32.mrb[5].mxu1 }
 0xc41   : > { %v1044_v14 = vcombine.high %v1040_v12, %v1040_v12  ;;  %v1051_v16 = vrot.slane %v1040_v12, %v2323_v21  ;;  %1681 = vst.sshfl [vmem:[#allocation3] sm:$0x3 pattern:$0x76325410] %v1040_v12 }
 0xc43   : > { %v1058_v17 = vrot.slane %v1044_v14, %v2323_v21  ;;  %v1059_v18 = vcombine.high %v1051_v16, %v1051_v16  ;;  %1682 = vst.sshfl [vmem:[#allocation3 + $0x4] sm:$0x3 pattern:$0x76325410] %v1044_v14  ;;  %v1157_v21 = vpop.permute.xlu0 %1156 }
 0xc45   : > { %v1060_v19 = vcombine.high %v1058_v17, %v1058_v17  ;;  %1066 = vst [vmem:[#allocation3 + $0x2] sm:$0x3] %v1059_v18 }
 0xc47   : > { %1068 = vst [vmem:[#allocation3 + $0x6] sm:$0x3] %v1060_v19 }
 0xc48   : > { %v1073_v20 = vld [vmem:[#allocation3] sm:$0x3] }
 0xc49   : > { %v1147_v22 = vadd.f32 %v1143_v8, %v1073_v20 }
 0xc4a   : > { %v1284_v54 = vld [vmem:[#allocation3 + $0x4] sm:$0x3] }
 0xc4b   : > { %2006 = vtanh.f32 %v1147_v22  ;;  %v1684_v24 = vmul.f32 -1.442695, %v1147_v22 }
 0xc4c   : > { %v1181_v37 = vld [vmem:[#allocation3 + $0x2] sm:$0x3] }
 0xc4d   : > { %2008 = vpow2.f32 %v1684_v24 }
 0xc4e   : > { %v1387_v9 = vld [vmem:[#allocation3 + $0x6] sm:$0x3] }
 0xc55   : > { %v2007_v23 = vpop.eup %2006 }
 0xc56   : > { %1161 = vrot.lane.b32.xlu1 %v2007_v23, %s2149_s22 }
 0xc57   : > { %v2009_v25 = vpop.eup %2008 }
 0xc58   : > { %v1151_v26 = vadd.f32 1.0, %v2009_v25 }
 0xc5a   : > { %2010 = vrcp.f32 %v1151_v26 }
 0xc64   : > { %v2011_v27 = vpop.eup %2010 }
 0xc65   : > { %v1159_v30 = vmul.f32 %v2011_v27, %v1157_v21 }
 0xcc8   : > { %v1162_v28 = vpop.permute.xlu1 %1161 }
 0xcc9   : > { %v1164_v29 = vmul.f32 %v2011_v27, %v1162_v28 }
 0xccb   : > { %1166 = vrot.lane.b32.xlu1 %v1164_v29, %s2149_s22 }
 0xd3d   : > { %v1167_v31 = vpop.permute.xlu1 %1166 }
 0xd3e   : > { %v1169_v32 = vadd.f32 %v1167_v31, %v1159_v30  ;;  %v1501_v30 = vld [vmem:[%s2508_s7 + $0x8] sm:$0xff] (!%p1691_p10)  ;;  %v1502_v31 = vld [vmem:[%s2508_s7 + $0x10] sm:$0xff] (!%p1691_p10) }
 0xd40   : > { %2012 = vtanh.f32 %v1169_v32 }
 0xd4a   : > { %v2013_v33 = vpop.eup %2012 }
 0xd4b   : > { %1172 = vrot.lane.b32.xlu0 %v2013_v33, %s2149_s22 }
 0xdbd   : > { %v1173_v34 = vpop.permute.xlu0 %1172 }
 0xdbe   : > { %v1175_v35 = vmul.f32 %v2011_v27, %v1173_v34  ;;  %v1503_v34 = vld [vmem:[%s2508_s7 + $0x18] sm:$0xff] (!%p1691_p10) }
 0xdc0   : > { %1177 = vrot.lane.b32.xlu1 %v1175_v35, %s2150_s23  ;;  %v2154_v35 = vmov (!%p1691_p10), 0.0  }
 0xe32   : > { %v1178_v36 = vpop.permute.xlu1 %1177 }
 0xe33   : > { %1180 = vst.msk [vmem:[#allocation2] sm:$0x3] %vm608_vm5, %v1178_v36  ;;  %1830 = vmatmul.mubr.msk.f32.vlgmr.msra.gmra.mrb[6].mxu1 %vm501_vm4, %v1178_v36  ;;  %v1923_v36 = vpack.c.bf16 (!%p1691_p10), %v1503_v34, %v1502_v31 }
 0xe34   : > { %1915 = vmatpush3.bf16.msra.mxu1 %v2398_v55  ;;  %1851 = vmatprep.mubr.msk.f32.mxu1 %vm2146_vm2, %v2145_v3 }
 0xe35   : > { %1916 = vmatprep.subr.bf16.mxu1 %v2148_v15 }
 0xe38   : > { %1918 = vmatpush3.bf16.msra.mxu1 %v2401_v59 }
 0xf06   : > { %v1250_v38 = vpop.f32.mrb[6].mxu1 }
 0xf07   : > { %v1254_v39 = vadd.f32 %v1250_v38, %v1181_v37  ;;  %v1831_v40 = vpop.f32.mrb[7].mxu1  ;;  %v1692_v38 = vld [vmem:[#allocation9] ss:$0 sm:$0xff] (!%p1691_p10) }
 0xf09   : > { %2014 = vtanh.f32 %v1254_v39  ;;  %v1686_v42 = vmul.f32 -1.442695, %v1254_v39 }
 0xf0b   : > { %2016 = vpow2.f32 %v1686_v42 }
 0xf13   : > { %v2015_v41 = vpop.eup %2014 }
 0xf14   : > { %1264 = vrot.lane.b32.xlu0 %v2015_v41, %s2149_s22 }
 0xf15   : > { %v2017_v44 = vpop.eup %2016 }
 0xf16   : > { %v1258_v45 = vadd.f32 1.0, %v2017_v44 }
 0xf18   : > { %2018 = vrcp.f32 %v1258_v45 }
 0xf22   : > { %v2019_v46 = vpop.eup %2018 }
 0xf23   : > { %v1262_v15 = vmul.f32 %v2019_v46, %v1169_v32  ;;  %v2152_v32 = vmov (!%p1691_p10), 0.0|0.0  }
 0xf24   : > { %1919 = vmatprep.subr.bf16.mxu0 (!%p1691_p10), %v2152_v32 }
 0xf86   : > { %v1265_v47 = vpop.permute.xlu0 %1264 }
 0xf87   : > { %v1267_v3 = vmul.f32 %v2019_v46, %v1265_v47 }
 0xf89   : > { %1269 = vrot.lane.b32.xlu1 %v1267_v3, %s2149_s22 }
 0xffb   : > { %v1270_v48 = vpop.permute.xlu1 %1269 }
 0xffc   : > { %v1272_v49 = vadd.f32 %v1270_v48, %v1262_v15 }
 0xffe   : > { %2020 = vtanh.f32 %v1272_v49 }
0x1008   : > { %v2021_v50 = vpop.eup %2020 }
0x1009   : > { %1275 = vrot.lane.b32.xlu0 %v2021_v50, %s2149_s22 }
0x107b   : > { %v1276_v51 = vpop.permute.xlu0 %1275 }
0x107c   : > { %v1278_v52 = vmul.f32 %v2019_v46, %v1276_v51 }
0x107e   : > { %1280 = vrot.lane.b32.xlu1 %v1278_v52, %s2150_s23 }
0x10f0   : > { %v1281_v53 = vpop.permute.xlu1 %1280 }
0x10f1   : > { %1283 = vst.msk [vmem:[#allocation2 + $0x2] sm:$0x3] %vm608_vm5, %v1281_v53  ;;  %1841 = vmatmul.mubr.msk.f32.vlgmr.msra.gmra.mrb[8].mxu0 %vm501_vm4, %v1281_v53 }
0x10f2   : > { %1862 = vmatprep.mubr.msk.f32.mxu0 (!%p1691_p10), %vm2153_vm6, %v2154_v35 }
0x11c4   : > { %v1353_v55 = vpop.f32.mrb[8].mxu0 }
0x11c5   : > { %v1357_v56 = vadd.f32 %v1353_v55, %v1284_v54  ;;  %v1842_v57 = vpop.f32.mrb[9].mxu0 }
0x11c7   : > { %2022 = vtanh.f32 %v1357_v56  ;;  %v1688_v59 = vmul.f32 -1.442695, %v1357_v56 }
0x11c9   : > { %2024 = vpow2.f32 %v1688_v59 }
0x11d1   : > { %v2023_v58 = vpop.eup %2022 }
0x11d2   : > { %1367 = vrot.lane.b32.xlu0 %v2023_v58, %s2149_s22 }
0x11d3   : > { %v2025_v60 = vpop.eup %2024 }
0x11d4   : > { %v1361_v61 = vadd.f32 1.0, %v2025_v60 }
0x11d6   : > { %2026 = vrcp.f32 %v1361_v61 }
0x11e0   : > { %v2027_v62 = vpop.eup %2026 }
0x11e1   : > { %v1365_v1 = vmul.f32 %v2027_v62, %v1272_v49 }
0x1244   : > { %v1368_v63 = vpop.permute.xlu0 %1367 }
0x1245   : > { %v1370_v0 = vmul.f32 %v2027_v62, %v1368_v63 }
0x1247   : > { %1372 = vrot.lane.b32.xlu1 %v1370_v0, %s2149_s22 }
0x12b9   : > { %v1373_v2 = vpop.permute.xlu1 %1372 }
0x12ba   : > { %v1375_v4 = vadd.f32 %v1373_v2, %v1365_v1 }
0x12bc   : > { %2028 = vtanh.f32 %v1375_v4 }
0x12c6   : > { %v2029_v5 = vpop.eup %2028 }
0x12c7   : > { %1378 = vrot.lane.b32.xlu0 %v2029_v5, %s2149_s22 }
0x1339   : > { %v1379_v6 = vpop.permute.xlu0 %1378 }
0x133a   : > { %v1381_v7 = vmul.f32 %v2027_v62, %v1379_v6 }
0x133c   : > { %1383 = vrot.lane.b32.xlu1 %v1381_v7, %s2150_s23 }
0x13ae   : > { %v1384_v8 = vpop.permute.xlu1 %1383 }
0x13af   : > { %1386 = vst.msk [vmem:[#allocation2 + $0x4] sm:$0x3] %vm608_vm5, %v1384_v8  ;;  %1852 = vmatmul.mubr.msk.f32.vlgmr.msra.gmra.mrb[8].mxu1 %vm501_vm4, %v1384_v8 }
0x1482   : > { %v1456_v10 = vpop.f32.mrb[8].mxu1 }
0x1483   : > { %v1460_v11 = vadd.f32 %v1456_v10, %v1387_v9  ;;  %v1853_v12 = vpop.f32.mrb[9].mxu1 }
0x1485   : > { %2030 = vtanh.f32 %v1460_v11  ;;  %v1690_v14 = vmul.f32 -1.442695, %v1460_v11 }
0x1487   : > { %2032 = vpow2.f32 %v1690_v14 }
0x148f   : > { %v2031_v13 = vpop.eup %2030 }
0x1490   : > { %1470 = vrot.lane.b32.xlu0 %v2031_v13, %s2149_s22 }
0x1491   : > { %v2033_v16 = vpop.eup %2032 }
0x1492   : > { %v1464_v17 = vadd.f32 1.0, %v2033_v16 }
0x1494   : > { %2034 = vrcp.f32 %v1464_v17 }
0x149e   : > { %v2035_v18 = vpop.eup %2034 }
0x149f   : > { %v1468_v22 = vmul.f32 %v2035_v18, %v1375_v4 }
0x1502   : > { %v1471_v19 = vpop.permute.xlu0 %1470 }
0x1503   : > { %v1473_v20 = vmul.f32 %v2035_v18, %v1471_v19 }
0x1505   : > { %1475 = vrot.lane.b32.xlu1 %v1473_v20, %s2149_s22 }
0x1509   : > { %927 = vrot.lane.b32.xlu1 %v2379_v43, %s2151_s14  ;;  %v1500_v43 = vld [vmem:[%s2508_s7] sm:$0xff] (!%p1691_p10) }
0x150a   : > { %v1920_v33 = vpack.c.bf16 (!%p1691_p10), %v1501_v30, %v1500_v43 }
0x150c   : > { %1921 = vmatpush3.bf16.msra.mxu0 (!%p1691_p10), %v1920_v33 }
0x150d   : > { %1922 = vmatprep.subr.bf16.mxu0 (!%p1691_p10), %v2152_v32 }
0x1510   : > { %1924 = vmatpush3.bf16.msra.mxu0 (!%p1691_p10), %v1923_v36 }
0x1577   : > { %v1476_v23 = vpop.permute.xlu1 %1475 }
0x1578   : > { %v1478_v24 = vadd.f32 %v1476_v23, %v1468_v22 }
0x157a   : > { %2036 = vtanh.f32 %v1478_v24  ;;  %1492 = vrot.lane.b32.xlu1 %v1478_v24, %s2151_s14 }
0x157b   : > { %v928_v25 = vpop.permute.xlu1 %927 }
0x157c   : > { %930 = vst.msk [vmem:[#allocation5] sm:$0x3] %vm608_vm5, %v928_v25 }
0x1584   : > { %v2037_v26 = vpop.eup %2036 }
0x1585   : > { %1481 = vrot.lane.b32.xlu0 %v2037_v26, %s2149_s22 }
0x15ec   : > { %v1493_v27 = vpop.permute.xlu1 %1492 }
0x15ed   : > { %1495 = vst.msk [vmem:[#allocation5 + $0x2] sm:$0x3] %vm608_vm5, %v1493_v27 }
0x15f7   : > { %v1482_v28 = vpop.permute.xlu0 %1481 }
0x15f8   : > { %v1484_v29 = vmul.f32 %v2035_v18, %v1482_v28 }
0x15fa   : > { %1486 = vrot.lane.b32.xlu0 %v1484_v29, %s2150_s23 }
0x1667   : > { %1499 = sbr.rel (%p1691_p10) target bundleno = 5964 (0x174c), region = 72 }
0x166c   : > { %v1487_v21 = vpop.permute.xlu0 %1486 }
0x166d   : > { %1489 = vst.msk [vmem:[#allocation2 + $0x6] sm:$0x3] %vm608_vm5, %v1487_v21  ;;  %1490 = vst.msk [vmem:[#allocation4 + $0x2] sm:$0x3] %vm608_vm5, %v1487_v21 }
0x1674   : > { %v1505_v37 = vld [vmem:[#allocation4 + $0x2] sm:$0x3] }
0x1675   : > { %1863 = vmatmul.mubr.msk.f32.vlgmr.msra.gmra.mrb[0].mxu0 %vm501_vm4, %v1505_v37 }
0x1748   : > { %v1581_v39 = vpop.f32.mrb[0].mxu0 }
0x1749   : > { %v1582_v40 = vadd.f32 %v1692_v38, %v1581_v39  ;;  %v1864_v41 = vpop.f32.mrb[1].mxu0 }
0x174b   : > { %1586 = vst.msk [vmem:[#allocation11] sm:$0x3] %vm1585_vm7, %v1582_v40 }
0x174c PF: > { %p1948_p11 = scmp.eq.s32.totalorder %s2212_s10, 1  ;;  %s2155_s16 = smov [#allocation11]  }
0x174d   : > { %s1594_s15 = sshll.u32 %s2155_s16, 4  ;;  %s1595_s15 = int_to_ptr.vmem [resolvable:$true] %s1594_s15 }
0x174e   : > { %s2094_s24 = scalar_lea.vmem %s1595_s15, 32  ;;  %p2101_p1 = scmp.lt.s32.totalorder %s1595_s15, %s1595_s15 }
0x174f   : > { %p2095_p12 = scmp.ne.s32.totalorder %s1595_s15, %s2094_s24  ;;  %p2102_p5 = scmp.lt.s32.totalorder %s2094_s24, %s2094_s24 }
0x1751   : > { %p2096_p13 = pnand %p2095_p12, %p1948_p11  ;;  %p2103_p7 = por %p2102_p5, %p2101_p1 }
0x1753   : > { %p2097_p0 = pneg %p2096_p13 }
0x1755   : > { %p2104_p8 = pnand %p2103_p7, %p2097_p0 }
0x1757   : > { %2107 = shalt.err (!%p2104_p8)
}
0x1758   : > { %s2108_s26 = scalar_lea.hbm %s2510_s9, 32 }
0x1759   : > { %p2109_p2 = scmp.ne.s32.totalorder %s2510_s9, %s2108_s26  ;;  %p2114_p9 = scmp.lt.u32.totalorder %s2108_s26, %s2510_s9 }
0x175b   : > { %p2110_p3 = pnand %p2109_p2, %p1948_p11 }
0x175d   : > { %p2111_p4 = pneg %p2110_p3 }
0x175f   : > { %p2116_p6 = pnand %p2114_p9, %p2111_p4 }
0x1761   : > { %2119 = shalt.err (!%p2116_p6)
}
0x1762   : > { %1934 = dma.vmem_to_hbm [thread:$0]  (%p1948_p11), %s1595_s15, 32, %s2510_s9, [#allocation8]  }
0x1763   : > { %2133 = dma.done.wait (%p1948_p11), [#allocation8], 32  }
0x1764   : > { %2135 = vsyncadd (%p1948_p11), [#allocation8], 4294967264 }
0x1765 PF: > { %s22_s30 = sadd.s32 1, %s2138_s30  }
0x1766   : > { %p19_p10 = scmp.ge.s32.totalorder %s22_s30, 4  }
0x1768   :  { %21 = sbr.rel (!%p19_p10) target bundleno = 3 (0x3), region = 108 }
0x176f   :  { %1607 = vsyncpa [#allocation7], 1 }
0x1770   :  { %1609 = vsyncpa [#allocation7 + $0x1], 1 }
0x1771   :  { %1610 = vsyncpa [#allocation10], 1 }
0x1772   :  { %1611 = vsyncpa [#allocation8], 1 }
0x1773   :  { %1613 = vsyncpa [#allocation8 + $0x1], 1 }

</bundles_post_ra>
